<compile_context>
chip_gen: v6e
topology: v6e:2x2x1
jax: 0.10.0
libtpu: 0.0.40
codegen_flags: <defaults>
</compile_context>

<pallas_src>
import math

import jax
import jax.numpy as jnp
from jax.experimental import pallas as pl
from jax.experimental.pallas import tpu as pltpu

# ----- hyperparameters (small, consistent with the module's forward) -----
VOCAB_SIZE = 8
D_MODEL = 32
N_HEAD = 4
HEAD_DIM = D_MODEL // N_HEAD
DIM_FEEDFORWARD = 64
NUM_ENCODER_LAYERS = 2
KERNEL_CONV1D = 3
STRIDE_CONV1D = 1
POOL_K = 128                    # AvgPool1d(kernel_size=128, stride=128)
SEQ_LEN = 1024
L_ENC = SEQ_LEN // POOL_K       # 8 tokens reach the transformer
FC_DIM = 64
OUTPUT_DIM = 1
MAX_LEN = 16
BATCH = 2
MOD = "met"
MASK = False                    # mask_embedding is False -> masking branch skipped
LN_EPS = 1e-5
INV_SQRT2 = 1.0 / math.sqrt(2.0)


def _layernorm(x, g, b):
    mu = jnp.mean(x, axis=-1, keepdims=True)
    xc = x - mu
    var = jnp.mean(xc * xc, axis=-1, keepdims=True)
    return xc * jax.lax.rsqrt(var + LN_EPS) * g + b


# ---------------------------------------------------------------------------
# Fused Pallas kernel (one grid step = one batch element)
# ---------------------------------------------------------------------------
def fused_forward_kernel(src_ref, met_ref, pe_ref, front_ref,
                         enc_w_ref, enc_ffn_ref, enc_b_ref, head_ref, out_ref):
    inv_pool = 1.0 / POOL_K

    src2d = src_ref[0]                         # (L_ENC, POOL_K) int32, one dense vreg tile
    met2d = met_ref[0]                         # (L_ENC, POOL_K) f32
    front = front_ref[...]                     # (32, 128): [tap0|tap1|tap2|emb/b_conv]

    emb = front[0:VOCAB_SIZE, 3 * D_MODEL:4 * D_MODEL]                 # (VOCAB, D)
    emb5 = emb[5:6, :]                                                 # (1, D)
    b_conv = front[VOCAB_SIZE:VOCAB_SIZE + 1, 3 * D_MODEL:4 * D_MODEL]  # (1, D)

    # ---- Frontend: AvgPool1d(128) commuted with embedding + Conv1d (all linear) ----
    # Block means of x (x[t] = emb[src[t]] + met[t]*emb[5]) via per-vocab lane counts.
    sum_x = jnp.sum(met2d, axis=1, keepdims=True) * emb5               # (L_ENC, D)
    for v in range(VOCAB_SIZE):
        cnt = jnp.sum((src2d == v).astype(jnp.float32), axis=1, keepdims=True)   # (L_ENC, 1)
        sum_x = sum_x + cnt * emb[v:v + 1, :]
    mean_x = sum_x * inv_pool                                          # mean of x over each block

    # Boundary rows x[128*i] and x[128*i + 127] (one-hot (8,8)@(8,32) gathers).
    iota_v = jax.lax.broadcasted_iota(jnp.int32, (L_ENC, VOCAB_SIZE), 1)
    oh_first = (src2d[:, 0:1] == iota_v).astype(jnp.float32)
    oh_last = (src2d[:, POOL_K - 1:POOL_K] == iota_v).astype(jnp.float32)
    x_first = (jnp.dot(oh_first, emb, preferred_element_type=jnp.float32)
               + met2d[:, 0:1] * emb5)                                 # (L_ENC, D)
    x_last = (jnp.dot(oh_last, emb, preferred_element_type=jnp.float32)
              + met2d[:, POOL_K - 1:POOL_K] * emb5)                    # (L_ENC, D)

    # Shift matrices: row i picks row i-1 / i+1, zero at the sequence edges (conv padding).
    ir = jax.lax.broadcasted_iota(jnp.int32, (L_ENC, L_ENC), 0)
    jc = jax.lax.broadcasted_iota(jnp.int32, (L_ENC, L_ENC), 1)
    shift_down = (jc + 1 == ir).astype(jnp.float32)
    shift_up = (jc == ir + 1).astype(jnp.float32)
    prev_last = jnp.dot(shift_down, x_last, preferred_element_type=jnp.float32)   # x[128i-1]
    next_first = jnp.dot(shift_up, x_first, preferred_element_type=jnp.float32)   # x[128i+128]

    mean_xm1 = mean_x + (prev_last - x_last) * inv_pool    # block means of x[t-1]
    mean_xp1 = mean_x + (next_first - x_first) * inv_pool  # block means of x[t+1]

    # Pooled Conv1d output: three (8,32)@(32,32) tap matmuls (tap0<->x[t-1], tap1<->x[t], ...).
    # (Real PyTorch Conv1d weights (Cout,Cin,K) must be permuted to tap_k = weight[:,:,k].T.)
    conv = (jnp.dot(mean_xm1, front[:, 0:D_MODEL], preferred_element_type=jnp.float32)
            + jnp.dot(mean_x, front[:, D_MODEL:2 * D_MODEL], preferred_element_type=jnp.float32)
            + jnp.dot(mean_xp1, front[:, 2 * D_MODEL:3 * D_MODEL], preferred_element_type=jnp.float32)
            + b_conv)

    # Positional encoding: reference indexes pe by *batch element*, broadcast over positions.
    x = conv + pe_ref[0]                                   # (L_ENC, D)

    # ---- TransformerEncoder: post-norm layers, ReLU FFN, dropout = identity ----
    scale = 1.0 / math.sqrt(HEAD_DIM)
    for l in range(NUM_ENCODER_LAYERS):
        w_attn = enc_w_ref[l]                              # (32, 128): [wqkv | wo]
        w_ffn = enc_ffn_ref[l]                             # (32, 128): [w1 | w2^T]
        b_all = enc_b_ref[l]                               # (8, 128): biases + LN params
        wqkv = w_attn[:, 0:3 * D_MODEL]
        wo = w_attn[:, 3 * D_MODEL:4 * D_MODEL]
        w1 = w_ffn[:, 0:DIM_FEEDFORWARD]
        w2t = w_ffn[:, DIM_FEEDFORWARD:2 * DIM_FEEDFORWARD]
        bqkv = b_all[0:1, 0:3 * D_MODEL]
        bo = b_all[0:1, 3 * D_MODEL:4 * D_MODEL]
        b1 = b_all[1:2, 0:DIM_FEEDFORWARD]
        b2 = b_all[1:2, DIM_FEEDFORWARD:DIM_FEEDFORWARD + D_MODEL]
        g1 = b_all[2:3, 0:D_MODEL]
        be1 = b_all[2:3, D_MODEL:2 * D_MODEL]
        g2 = b_all[2:3, 2 * D_MODEL:3 * D_MODEL]
        be2 = b_all[2:3, 3 * D_MODEL:4 * D_MODEL]

        qkv = jnp.dot(x, wqkv, preferred_element_type=jnp.float32) + bqkv    # (L, 3D)
        attn = jnp.zeros((L_ENC, D_MODEL), jnp.float32)
        for h in range(N_HEAD):
            lo = h * HEAD_DIM
            qh = qkv[:, lo:lo + HEAD_DIM] * scale
            kh = qkv[:, D_MODEL + lo:D_MODEL + lo + HEAD_DIM]
            vh = qkv[:, 2 * D_MODEL + lo:2 * D_MODEL + lo + HEAD_DIM]
            s = jax.lax.dot_general(qh, kh, (((1,), (1,)), ((), ())),
                                    preferred_element_type=jnp.float32)      # (L, L)
            s = s - jnp.max(s, axis=-1, keepdims=True)
            p = jnp.exp(s)
            p = p * pl.reciprocal(jnp.sum(p, axis=-1, keepdims=True), approx=True)
            oh = jnp.dot(p, vh, preferred_element_type=jnp.float32)          # (L, hd)
            # Accumulate straight through this head's rows of Wo (no head concat).
            attn = attn + jnp.dot(oh, wo[lo:lo + HEAD_DIM, :],
                                  preferred_element_type=jnp.float32)
        attn = attn + bo
        x = _layernorm(x + attn, g1, be1)
        h1 = jnp.maximum(jnp.dot(x, w1, preferred_element_type=jnp.float32) + b1, 0.0)
        ff = jax.lax.dot_general(h1, w2t, (((1,), (1,)), ((), ())),
                                 preferred_element_type=jnp.float32) + b2
        x = _layernorm(x + ff, g2, be2)

    # ---- Head: AdaptiveAvgPool1d(1) over length -> Linear -> GELU -> Linear ----
    head = head_ref[...]                                   # (D+3, FC_DIM)
    pooled = jnp.mean(x, axis=0, keepdims=True)            # (1, D)
    w_fc1 = head[0:D_MODEL, :]
    b_fc1 = head[D_MODEL:D_MODEL + 1, :]
    w_fc2t = head[D_MODEL + 1:D_MODEL + 2, :]              # (1, FC_DIM) = w_fc2^T
    b_fc2 = head[D_MODEL + 2:D_MODEL + 3, 0:1]             # (1, 1)
    hdn = jnp.dot(pooled, w_fc1, preferred_element_type=jnp.float32) + b_fc1
    hdn = 0.5 * hdn * (1.0 + jax.lax.erf(hdn * INV_SQRT2))  # exact GELU (nn.GELU default)
    out_ref[0] = jnp.sum(hdn * w_fc2t, axis=1, keepdims=True) + b_fc2


# ---------------------------------------------------------------------------
# pallas_call wrapper (single launch for the whole forward pass)
# ---------------------------------------------------------------------------
def fused_forward(params, src_blk, met_blk):
    per_b = lambda b: (b, 0, 0)
    const2 = lambda b: (0, 0)
    const3 = lambda b: (0, 0, 0)
    return pl.pallas_call(
        fused_forward_kernel,
        out_shape=jax.ShapeDtypeStruct((BATCH, 1, OUTPUT_DIM), jnp.float32),
        grid=(BATCH,),
        in_specs=[
            pl.BlockSpec((1, L_ENC, POOL_K), per_b),                       # src  (lane-dense)
            pl.BlockSpec((1, L_ENC, POOL_K), per_b),                       # met  (lane-dense)
            pl.BlockSpec((1, 1, D_MODEL), per_b),                          # pe (per-batch quirk)
            pl.BlockSpec((D_MODEL, 128), const2),                          # conv taps|emb|b_conv
            pl.BlockSpec((NUM_ENCODER_LAYERS, D_MODEL, 128), const3),      # [wqkv | wo]
            pl.BlockSpec((NUM_ENCODER_LAYERS, D_MODEL, 128), const3),      # [w1 | w2^T]
            pl.BlockSpec((NUM_ENCODER_LAYERS, 8, 128), const3),            # biases + LN
            pl.BlockSpec((D_MODEL + 3, FC_DIM), const2),                   # head (fc1|b1|fc2^T|b2)
        ],
        out_specs=pl.BlockSpec((1, 1, OUTPUT_DIM), per_b),
        compiler_params=pltpu.CompilerParams(
            dimension_semantics=("parallel",),            # batch -> both TCs on v7x
            vmem_limit_bytes=32 * 1024 * 1024),
    )(src_blk, met_blk, params["pe"], params["front"], params["enc_w"],
      params["enc_ffn"], params["enc_b"], params["head"])


# ---------------------------------------------------------------------------
# Parameters (deterministic synthetic init, shapes from the module __init__),
# packed into a few lane-dense buffers for the kernel.
# ---------------------------------------------------------------------------
def init_params(key):
    keys = iter(jax.random.split(key, 16))

    def u(shape, scale):
        return jax.random.uniform(next(keys), shape, jnp.float32, -scale, scale)

    L = NUM_ENCODER_LAYERS
    # --- logical parameters ---
    embed = u((VOCAB_SIZE, D_MODEL), 0.05)            # nn.Embedding init uniform(-0.05, 0.05)
    cscale = 1.0 / math.sqrt(D_MODEL * KERNEL_CONV1D)
    w_conv = u((KERNEL_CONV1D, D_MODEL, D_MODEL), cscale)   # tap k as (Cin, Cout) = weight[:,:,k].T
    b_conv = u((D_MODEL,), cscale)

    dscale = 1.0 / math.sqrt(D_MODEL)
    fscale = 1.0 / math.sqrt(DIM_FEEDFORWARD)
    wqkv = u((L, D_MODEL, 3 * D_MODEL), dscale)
    bqkv = u((L, 3 * D_MODEL), dscale)
    wo = u((L, D_MODEL, D_MODEL), dscale)
    bo = u((L, D_MODEL), dscale)
    w1 = u((L, D_MODEL, DIM_FEEDFORWARD), dscale)
    b1 = u((L, DIM_FEEDFORWARD), dscale)
    w2 = u((L, DIM_FEEDFORWARD, D_MODEL), fscale)
    b2 = u((L, D_MODEL), fscale)
    w_fc1 = u((D_MODEL, FC_DIM), dscale)
    b_fc1 = u((FC_DIM,), dscale)
    w_fc2 = u((FC_DIM, OUTPUT_DIM), fscale)
    b_fc2 = u((OUTPUT_DIM,), fscale)

    # PositionalEncoding buffer pe[MAX_LEN, 1, D]; the forward adds pe[:batch]
    # (indexed by batch element, broadcast over the 8 positions — reference behavior).
    pos = jnp.arange(MAX_LEN, dtype=jnp.float32)[:, None]
    div = jnp.exp(jnp.arange(0, D_MODEL, 2, dtype=jnp.float32) * (-math.log(10000.0) / D_MODEL))
    pe = jnp.zeros((MAX_LEN, D_MODEL), jnp.float32)
    pe = pe.at[:, 0::2].set(jnp.sin(pos * div))
    pe = pe.at[:, 1::2].set(jnp.cos(pos * div))

    # --- packed kernel buffers ---
    front = jnp.zeros((D_MODEL, 128), jnp.float32)
    for k in range(KERNEL_CONV1D):
        front = front.at[:, k * D_MODEL:(k + 1) * D_MODEL].set(w_conv[k])
    front = front.at[0:VOCAB_SIZE, 3 * D_MODEL:4 * D_MODEL].set(embed)
    front = front.at[VOCAB_SIZE, 3 * D_MODEL:4 * D_MODEL].set(b_conv)

    enc_w = jnp.zeros((L, D_MODEL, 128), jnp.float32)
    enc_w = enc_w.at[:, :, 0:3 * D_MODEL].set(wqkv)
    enc_w = enc_w.at[:, :, 3 * D_MODEL:4 * D_MODEL].set(wo)

    enc_ffn = jnp.zeros((L, D_MODEL, 128), jnp.float32)
    enc_ffn = enc_ffn.at[:, :, 0:DIM_FEEDFORWARD].set(w1)
    enc_ffn = enc_ffn.at[:, :, DIM_FEEDFORWARD:2 * DIM_FEEDFORWARD].set(
        jnp.transpose(w2, (0, 2, 1)))

    enc_b = jnp.zeros((L, 8, 128), jnp.float32)
    enc_b = enc_b.at[:, 0, 0:3 * D_MODEL].set(bqkv)
    enc_b = enc_b.at[:, 0, 3 * D_MODEL:4 * D_MODEL].set(bo)
    enc_b = enc_b.at[:, 1, 0:DIM_FEEDFORWARD].set(b1)
    enc_b = enc_b.at[:, 1, DIM_FEEDFORWARD:DIM_FEEDFORWARD + D_MODEL].set(b2)
    enc_b = enc_b.at[:, 2, 0:D_MODEL].set(1.0)                 # LN1 gamma (beta = 0)
    enc_b = enc_b.at[:, 2, 2 * D_MODEL:3 * D_MODEL].set(1.0)   # LN2 gamma (beta = 0)

    head = jnp.zeros((D_MODEL + 3, FC_DIM), jnp.float32)
    head = head.at[0:D_MODEL, :].set(w_fc1)
    head = head.at[D_MODEL, :].set(b_fc1)
    head = head.at[D_MODEL + 1, :].set(w_fc2[:, 0])
    head = head.at[D_MODEL + 2, 0].set(b_fc2[0])

    return {"pe": pe[:BATCH][:, None, :], "front": front, "enc_w": enc_w,
            "enc_ffn": enc_ffn, "enc_b": enc_b, "head": head}


# ---------------------------------------------------------------------------
# Forward pass
# ---------------------------------------------------------------------------
def multimod_alberto_forward(params, src, met):
    src_blk = src.astype(jnp.int32).reshape(BATCH, L_ENC, POOL_K)     # (B, 8, 128)
    met_blk = met.astype(jnp.float32).reshape(BATCH, L_ENC, POOL_K)   # (B, 8, 128)
    y = fused_forward(params, src_blk, met_blk)                       # (B, 1, OUTPUT_DIM)
    return jnp.squeeze(y)                                             # matches .squeeze() -> (B,)


if __name__ == "__main__":
    key = jax.random.PRNGKey(0)
    kp, ks, km = jax.random.split(key, 3)
    params = init_params(kp)
    src = jax.random.randint(ks, (BATCH, SEQ_LEN), 0, VOCAB_SIZE, dtype=jnp.int32)
    met = jax.random.uniform(km, (BATCH, SEQ_LEN), jnp.float32)
    fwd = jax.jit(multimod_alberto_forward)
    out = jax.block_until_ready(fwd(params, src, met))
    assert out.shape == (BATCH,), out.shape
    assert bool(jnp.all(jnp.isfinite(out)))
    print("KERNEL_OK")
</pallas_src>

<mosaic_0001>
module attributes {stable_mosaic.version = 11 : i64} {
  func.func @fused_forward_kernel(%arg0: i32, %arg1: memref<1x8x128xi32, #tpu.memory_space<vmem>>, %arg2: memref<1x8x128xf32, #tpu.memory_space<vmem>>, %arg3: memref<1x1x32xf32, #tpu.memory_space<vmem>>, %arg4: memref<32x128xf32, #tpu.memory_space<vmem>>, %arg5: memref<2x32x128xf32, #tpu.memory_space<vmem>>, %arg6: memref<2x32x128xf32, #tpu.memory_space<vmem>>, %arg7: memref<2x8x128xf32, #tpu.memory_space<vmem>>, %arg8: memref<35x64xf32, #tpu.memory_space<vmem>>, %arg9: memref<1x1x1xf32, #tpu.memory_space<vmem>>) attributes {dimension_semantics = [#tpu.dimension_semantics<parallel>], iteration_bounds = array<i64: 2>, scalar_prefetch = 0 : i64, scratch_operands = 0 : i64, tpu.core_type = #tpu.core_type<tc>, window_params = [{transform_indices = @transform_0, window_bounds = array<i64: 1, 8, 128>}, {transform_indices = @transform_1, window_bounds = array<i64: 1, 8, 128>}, {transform_indices = @transform_2, window_bounds = array<i64: 1, 1, 32>}, {pipeline_mode = #tpu.pipeline_mode<synchronous>, transform_indices = @transform_3, window_bounds = array<i64: 32, 128>}, {pipeline_mode = #tpu.pipeline_mode<synchronous>, transform_indices = @transform_4, window_bounds = array<i64: 2, 32, 128>}, {pipeline_mode = #tpu.pipeline_mode<synchronous>, transform_indices = @transform_5, window_bounds = array<i64: 2, 32, 128>}, {pipeline_mode = #tpu.pipeline_mode<synchronous>, transform_indices = @transform_6, window_bounds = array<i64: 2, 8, 128>}, {pipeline_mode = #tpu.pipeline_mode<synchronous>, transform_indices = @transform_7, window_bounds = array<i64: 35, 64>}, {transform_indices = @transform_8, window_bounds = array<i64: 1, 1, 1>}]} {
    %c0 = arith.constant 0 : index
    %c0_0 = arith.constant 0 : index
    %c0_1 = arith.constant 0 : index
    %0 = vector.load %arg1[%c0, %c0_0, %c0_1] : memref<1x8x128xi32, #tpu.memory_space<vmem>>, vector<1x8x128xi32>
    %1 = vector.shape_cast %0 : vector<1x8x128xi32> to vector<8x128xi32>
    %c0_2 = arith.constant 0 : index
    %c0_3 = arith.constant 0 : index
    %c0_4 = arith.constant 0 : index
    %2 = vector.load %arg2[%c0_2, %c0_3, %c0_4] : memref<1x8x128xf32, #tpu.memory_space<vmem>>, vector<1x8x128xf32>
    %3 = vector.shape_cast %2 : vector<1x8x128xf32> to vector<8x128xf32>
    %c0_5 = arith.constant 0 : index
    %c0_6 = arith.constant 0 : index
    %4 = vector.load %arg4[%c0_5, %c0_6] : memref<32x128xf32, #tpu.memory_space<vmem>>, vector<32x128xf32>
    %5 = vector.extract_strided_slice %4 {offsets = [0, 96], sizes = [8, 32], strides = [1, 1]} : vector<32x128xf32> to vector<8x32xf32>
    %6 = vector.extract_strided_slice %5 {offsets = [5, 0], sizes = [1, 32], strides = [1, 1]} : vector<8x32xf32> to vector<1x32xf32>
    %7 = vector.extract_strided_slice %4 {offsets = [8, 96], sizes = [1, 32], strides = [1, 1]} : vector<32x128xf32> to vector<1x32xf32>
    %cst = arith.constant dense<0.000000e+00> : vector<8xf32>
    %8 = vector.multi_reduction <add>, %3, %cst [1] : vector<8x128xf32> to vector<8xf32>
    %9 = vector.shape_cast %8 : vector<8xf32> to vector<8x1xf32>
    %10 = vector.broadcast %9 : vector<8x1xf32> to vector<8x32xf32>
    %11 = vector.broadcast %6 : vector<1x32xf32> to vector<8x32xf32>
    %12 = arith.mulf %10, %11 : vector<8x32xf32>
    %c0_i32 = arith.constant 0 : i32
    %13 = vector.broadcast %c0_i32 : i32 to vector<8x128xi32>
    %14 = arith.cmpi eq, %1, %13 : vector<8x128xi32>
    %15 = arith.extui %14 : vector<8x128xi1> to vector<8x128xi32>
    %16 = arith.sitofp %15 : vector<8x128xi32> to vector<8x128xf32>
    %cst_7 = arith.constant dense<0.000000e+00> : vector<8xf32>
    %17 = vector.multi_reduction <add>, %16, %cst_7 [1] : vector<8x128xf32> to vector<8xf32>
    %18 = vector.shape_cast %17 : vector<8xf32> to vector<8x1xf32>
    %19 = vector.extract_strided_slice %5 {offsets = [0, 0], sizes = [1, 32], strides = [1, 1]} : vector<8x32xf32> to vector<1x32xf32>
    %20 = vector.broadcast %18 : vector<8x1xf32> to vector<8x32xf32>
    %21 = vector.broadcast %19 : vector<1x32xf32> to vector<8x32xf32>
    %22 = arith.mulf %20, %21 : vector<8x32xf32>
    %23 = arith.addf %12, %22 : vector<8x32xf32>
    %c1_i32 = arith.constant 1 : i32
    %24 = vector.broadcast %c1_i32 : i32 to vector<8x128xi32>
    %25 = arith.cmpi eq, %1, %24 : vector<8x128xi32>
    %26 = arith.extui %25 : vector<8x128xi1> to vector<8x128xi32>
    %27 = arith.sitofp %26 : vector<8x128xi32> to vector<8x128xf32>
    %cst_8 = arith.constant dense<0.000000e+00> : vector<8xf32>
    %28 = vector.multi_reduction <add>, %27, %cst_8 [1] : vector<8x128xf32> to vector<8xf32>
    %29 = vector.shape_cast %28 : vector<8xf32> to vector<8x1xf32>
    %30 = vector.extract_strided_slice %5 {offsets = [1, 0], sizes = [1, 32], strides = [1, 1]} : vector<8x32xf32> to vector<1x32xf32>
    %31 = vector.broadcast %29 : vector<8x1xf32> to vector<8x32xf32>
    %32 = vector.broadcast %30 : vector<1x32xf32> to vector<8x32xf32>
    %33 = arith.mulf %31, %32 : vector<8x32xf32>
    %34 = arith.addf %23, %33 : vector<8x32xf32>
    %c2_i32 = arith.constant 2 : i32
    %35 = vector.broadcast %c2_i32 : i32 to vector<8x128xi32>
    %36 = arith.cmpi eq, %1, %35 : vector<8x128xi32>
    %37 = arith.extui %36 : vector<8x128xi1> to vector<8x128xi32>
    %38 = arith.sitofp %37 : vector<8x128xi32> to vector<8x128xf32>
    %cst_9 = arith.constant dense<0.000000e+00> : vector<8xf32>
    %39 = vector.multi_reduction <add>, %38, %cst_9 [1] : vector<8x128xf32> to vector<8xf32>
    %40 = vector.shape_cast %39 : vector<8xf32> to vector<8x1xf32>
    %41 = vector.extract_strided_slice %5 {offsets = [2, 0], sizes = [1, 32], strides = [1, 1]} : vector<8x32xf32> to vector<1x32xf32>
    %42 = vector.broadcast %40 : vector<8x1xf32> to vector<8x32xf32>
    %43 = vector.broadcast %41 : vector<1x32xf32> to vector<8x32xf32>
    %44 = arith.mulf %42, %43 : vector<8x32xf32>
    %45 = arith.addf %34, %44 : vector<8x32xf32>
    %c3_i32 = arith.constant 3 : i32
    %46 = vector.broadcast %c3_i32 : i32 to vector<8x128xi32>
    %47 = arith.cmpi eq, %1, %46 : vector<8x128xi32>
    %48 = arith.extui %47 : vector<8x128xi1> to vector<8x128xi32>
    %49 = arith.sitofp %48 : vector<8x128xi32> to vector<8x128xf32>
    %cst_10 = arith.constant dense<0.000000e+00> : vector<8xf32>
    %50 = vector.multi_reduction <add>, %49, %cst_10 [1] : vector<8x128xf32> to vector<8xf32>
    %51 = vector.shape_cast %50 : vector<8xf32> to vector<8x1xf32>
    %52 = vector.extract_strided_slice %5 {offsets = [3, 0], sizes = [1, 32], strides = [1, 1]} : vector<8x32xf32> to vector<1x32xf32>
    %53 = vector.broadcast %51 : vector<8x1xf32> to vector<8x32xf32>
    %54 = vector.broadcast %52 : vector<1x32xf32> to vector<8x32xf32>
    %55 = arith.mulf %53, %54 : vector<8x32xf32>
    %56 = arith.addf %45, %55 : vector<8x32xf32>
    %c4_i32 = arith.constant 4 : i32
    %57 = vector.broadcast %c4_i32 : i32 to vector<8x128xi32>
    %58 = arith.cmpi eq, %1, %57 : vector<8x128xi32>
    %59 = arith.extui %58 : vector<8x128xi1> to vector<8x128xi32>
    %60 = arith.sitofp %59 : vector<8x128xi32> to vector<8x128xf32>
    %cst_11 = arith.constant dense<0.000000e+00> : vector<8xf32>
    %61 = vector.multi_reduction <add>, %60, %cst_11 [1] : vector<8x128xf32> to vector<8xf32>
    %62 = vector.shape_cast %61 : vector<8xf32> to vector<8x1xf32>
    %63 = vector.extract_strided_slice %5 {offsets = [4, 0], sizes = [1, 32], strides = [1, 1]} : vector<8x32xf32> to vector<1x32xf32>
    %64 = vector.broadcast %62 : vector<8x1xf32> to vector<8x32xf32>
    %65 = vector.broadcast %63 : vector<1x32xf32> to vector<8x32xf32>
    %66 = arith.mulf %64, %65 : vector<8x32xf32>
    %67 = arith.addf %56, %66 : vector<8x32xf32>
    %c5_i32 = arith.constant 5 : i32
    %68 = vector.broadcast %c5_i32 : i32 to vector<8x128xi32>
    %69 = arith.cmpi eq, %1, %68 : vector<8x128xi32>
    %70 = arith.extui %69 : vector<8x128xi1> to vector<8x128xi32>
    %71 = arith.sitofp %70 : vector<8x128xi32> to vector<8x128xf32>
    %cst_12 = arith.constant dense<0.000000e+00> : vector<8xf32>
    %72 = vector.multi_reduction <add>, %71, %cst_12 [1] : vector<8x128xf32> to vector<8xf32>
    %73 = vector.shape_cast %72 : vector<8xf32> to vector<8x1xf32>
    %74 = vector.extract_strided_slice %5 {offsets = [5, 0], sizes = [1, 32], strides = [1, 1]} : vector<8x32xf32> to vector<1x32xf32>
    %75 = vector.broadcast %73 : vector<8x1xf32> to vector<8x32xf32>
    %76 = vector.broadcast %74 : vector<1x32xf32> to vector<8x32xf32>
    %77 = arith.mulf %75, %76 : vector<8x32xf32>
    %78 = arith.addf %67, %77 : vector<8x32xf32>
    %c6_i32 = arith.constant 6 : i32
    %79 = vector.broadcast %c6_i32 : i32 to vector<8x128xi32>
    %80 = arith.cmpi eq, %1, %79 : vector<8x128xi32>
    %81 = arith.extui %80 : vector<8x128xi1> to vector<8x128xi32>
    %82 = arith.sitofp %81 : vector<8x128xi32> to vector<8x128xf32>
    %cst_13 = arith.constant dense<0.000000e+00> : vector<8xf32>
    %83 = vector.multi_reduction <add>, %82, %cst_13 [1] : vector<8x128xf32> to vector<8xf32>
    %84 = vector.shape_cast %83 : vector<8xf32> to vector<8x1xf32>
    %85 = vector.extract_strided_slice %5 {offsets = [6, 0], sizes = [1, 32], strides = [1, 1]} : vector<8x32xf32> to vector<1x32xf32>
    %86 = vector.broadcast %84 : vector<8x1xf32> to vector<8x32xf32>
    %87 = vector.broadcast %85 : vector<1x32xf32> to vector<8x32xf32>
    %88 = arith.mulf %86, %87 : vector<8x32xf32>
    %89 = arith.addf %78, %88 : vector<8x32xf32>
    %c7_i32 = arith.constant 7 : i32
    %90 = vector.broadcast %c7_i32 : i32 to vector<8x128xi32>
    %91 = arith.cmpi eq, %1, %90 : vector<8x128xi32>
    %92 = arith.extui %91 : vector<8x128xi1> to vector<8x128xi32>
    %93 = arith.sitofp %92 : vector<8x128xi32> to vector<8x128xf32>
    %cst_14 = arith.constant dense<0.000000e+00> : vector<8xf32>
    %94 = vector.multi_reduction <add>, %93, %cst_14 [1] : vector<8x128xf32> to vector<8xf32>
    %95 = vector.shape_cast %94 : vector<8xf32> to vector<8x1xf32>
    %96 = vector.extract_strided_slice %5 {offsets = [7, 0], sizes = [1, 32], strides = [1, 1]} : vector<8x32xf32> to vector<1x32xf32>
    %97 = vector.broadcast %95 : vector<8x1xf32> to vector<8x32xf32>
    %98 = vector.broadcast %96 : vector<1x32xf32> to vector<8x32xf32>
    %99 = arith.mulf %97, %98 : vector<8x32xf32>
    %100 = arith.addf %89, %99 : vector<8x32xf32>
    %cst_15 = arith.constant 7.812500e-03 : f32
    %101 = vector.broadcast %cst_15 : f32 to vector<8x32xf32>
    %102 = arith.mulf %100, %101 : vector<8x32xf32>
    %103 = tpu.iota {dimensions = array<i32: 1>} : vector<8x8xi32>
    %104 = vector.extract_strided_slice %1 {offsets = [0, 0], sizes = [8, 1], strides = [1, 1]} : vector<8x128xi32> to vector<8x1xi32>
    %105 = vector.broadcast %104 : vector<8x1xi32> to vector<8x8xi32>
    %106 = arith.cmpi eq, %105, %103 : vector<8x8xi32>
    %107 = arith.extui %106 : vector<8x8xi1> to vector<8x8xi32>
    %108 = arith.sitofp %107 : vector<8x8xi32> to vector<8x8xf32>
    %109 = vector.extract_strided_slice %1 {offsets = [0, 127], sizes = [8, 1], strides = [1, 1]} : vector<8x128xi32> to vector<8x1xi32>
    %110 = vector.broadcast %109 : vector<8x1xi32> to vector<8x8xi32>
    %111 = arith.cmpi eq, %110, %103 : vector<8x8xi32>
    %112 = arith.extui %111 : vector<8x8xi1> to vector<8x8xi32>
    %113 = arith.sitofp %112 : vector<8x8xi32> to vector<8x8xf32>
    %cst_16 = arith.constant dense<0.000000e+00> : vector<8x32xf32>
    %114 = tpu.matmul %108, %5, %cst_16 {dimension_numbers = #tpu.dot_dimension_numbers<[1], [0], [0], [1], [0, 0, 1, 1], [], []>} : vector<8x8xf32>, vector<8x32xf32>, vector<8x32xf32> -> vector<8x32xf32>
    %115 = vector.extract_strided_slice %3 {offsets = [0, 0], sizes = [8, 1], strides = [1, 1]} : vector<8x128xf32> to vector<8x1xf32>
    %116 = vector.broadcast %115 : vector<8x1xf32> to vector<8x32xf32>
    %117 = vector.broadcast %6 : vector<1x32xf32> to vector<8x32xf32>
    %118 = arith.mulf %116, %117 : vector<8x32xf32>
    %119 = arith.addf %114, %118 : vector<8x32xf32>
    %cst_17 = arith.constant dense<0.000000e+00> : vector<8x32xf32>
    %120 = tpu.matmul %113, %5, %cst_17 {dimension_numbers = #tpu.dot_dimension_numbers<[1], [0], [0], [1], [0, 0, 1, 1], [], []>} : vector<8x8xf32>, vector<8x32xf32>, vector<8x32xf32> -> vector<8x32xf32>
    %121 = vector.extract_strided_slice %3 {offsets = [0, 127], sizes = [8, 1], strides = [1, 1]} : vector<8x128xf32> to vector<8x1xf32>
    %122 = vector.broadcast %121 : vector<8x1xf32> to vector<8x32xf32>
    %123 = vector.broadcast %6 : vector<1x32xf32> to vector<8x32xf32>
    %124 = arith.mulf %122, %123 : vector<8x32xf32>
    %125 = arith.addf %120, %124 : vector<8x32xf32>
    %126 = tpu.iota {dimensions = array<i32: 0>} : vector<8x8xi32>
    %127 = tpu.iota {dimensions = array<i32: 1>} : vector<8x8xi32>
    %c1_i32_18 = arith.constant 1 : i32
    %128 = vector.broadcast %c1_i32_18 : i32 to vector<8x8xi32>
    %129 = arith.addi %127, %128 : vector<8x8xi32>
    %130 = arith.cmpi eq, %129, %126 : vector<8x8xi32>
    %131 = arith.extui %130 : vector<8x8xi1> to vector<8x8xi32>
    %132 = arith.sitofp %131 : vector<8x8xi32> to vector<8x8xf32>
    %c1_i32_19 = arith.constant 1 : i32
    %133 = vector.broadcast %c1_i32_19 : i32 to vector<8x8xi32>
    %134 = arith.addi %126, %133 : vector<8x8xi32>
    %135 = arith.cmpi eq, %127, %134 : vector<8x8xi32>
    %136 = arith.extui %135 : vector<8x8xi1> to vector<8x8xi32>
    %137 = arith.sitofp %136 : vector<8x8xi32> to vector<8x8xf32>
    %cst_20 = arith.constant dense<0.000000e+00> : vector<8x32xf32>
    %138 = tpu.matmul %132, %125, %cst_20 {dimension_numbers = #tpu.dot_dimension_numbers<[1], [0], [0], [1], [0, 0, 1, 1], [], []>} : vector<8x8xf32>, vector<8x32xf32>, vector<8x32xf32> -> vector<8x32xf32>
    %cst_21 = arith.constant dense<0.000000e+00> : vector<8x32xf32>
    %139 = tpu.matmul %137, %119, %cst_21 {dimension_numbers = #tpu.dot_dimension_numbers<[1], [0], [0], [1], [0, 0, 1, 1], [], []>} : vector<8x8xf32>, vector<8x32xf32>, vector<8x32xf32> -> vector<8x32xf32>
    %140 = arith.subf %138, %125 : vector<8x32xf32>
    %cst_22 = arith.constant 7.812500e-03 : f32
    %141 = vector.broadcast %cst_22 : f32 to vector<8x32xf32>
    %142 = arith.mulf %140, %141 : vector<8x32xf32>
    %143 = arith.addf %102, %142 : vector<8x32xf32>
    %144 = arith.subf %139, %119 : vector<8x32xf32>
    %cst_23 = arith.constant 7.812500e-03 : f32
    %145 = vector.broadcast %cst_23 : f32 to vector<8x32xf32>
    %146 = arith.mulf %144, %145 : vector<8x32xf32>
    %147 = arith.addf %102, %146 : vector<8x32xf32>
    %148 = vector.extract_strided_slice %4 {offsets = [0, 0], sizes = [32, 32], strides = [1, 1]} : vector<32x128xf32> to vector<32x32xf32>
    %cst_24 = arith.constant dense<0.000000e+00> : vector<8x32xf32>
    %149 = tpu.matmul %143, %148, %cst_24 {dimension_numbers = #tpu.dot_dimension_numbers<[1], [0], [0], [1], [0, 0, 1, 1], [], []>} : vector<8x32xf32>, vector<32x32xf32>, vector<8x32xf32> -> vector<8x32xf32>
    %150 = vector.extract_strided_slice %4 {offsets = [0, 32], sizes = [32, 32], strides = [1, 1]} : vector<32x128xf32> to vector<32x32xf32>
    %cst_25 = arith.constant dense<0.000000e+00> : vector<8x32xf32>
    %151 = tpu.matmul %102, %150, %cst_25 {dimension_numbers = #tpu.dot_dimension_numbers<[1], [0], [0], [1], [0, 0, 1, 1], [], []>} : vector<8x32xf32>, vector<32x32xf32>, vector<8x32xf32> -> vector<8x32xf32>
    %152 = arith.addf %149, %151 : vector<8x32xf32>
    %153 = vector.extract_strided_slice %4 {offsets = [0, 64], sizes = [32, 32], strides = [1, 1]} : vector<32x128xf32> to vector<32x32xf32>
    %cst_26 = arith.constant dense<0.000000e+00> : vector<8x32xf32>
    %154 = tpu.matmul %147, %153, %cst_26 {dimension_numbers = #tpu.dot_dimension_numbers<[1], [0], [0], [1], [0, 0, 1, 1], [], []>} : vector<8x32xf32>, vector<32x32xf32>, vector<8x32xf32> -> vector<8x32xf32>
    %155 = arith.addf %152, %154 : vector<8x32xf32>
    %156 = vector.broadcast %7 : vector<1x32xf32> to vector<8x32xf32>
    %157 = arith.addf %155, %156 : vector<8x32xf32>
    %c0_27 = arith.constant 0 : index
    %c0_28 = arith.constant 0 : index
    %c0_29 = arith.constant 0 : index
    %158 = vector.load %arg3[%c0_27, %c0_28, %c0_29] : memref<1x1x32xf32, #tpu.memory_space<vmem>>, vector<1x1x32xf32>
    %159 = vector.shape_cast %158 : vector<1x1x32xf32> to vector<1x32xf32>
    %160 = vector.broadcast %159 : vector<1x32xf32> to vector<8x32xf32>
    %161 = arith.addf %157, %160 : vector<8x32xf32>
    %c0_30 = arith.constant 0 : index
    %c0_31 = arith.constant 0 : index
    %c0_32 = arith.constant 0 : index
    %162 = vector.load %arg5[%c0_30, %c0_31, %c0_32] : memref<2x32x128xf32, #tpu.memory_space<vmem>>, vector<1x32x128xf32>
    %163 = vector.shape_cast %162 : vector<1x32x128xf32> to vector<32x128xf32>
    %c0_33 = arith.constant 0 : index
    %c0_34 = arith.constant 0 : index
    %c0_35 = arith.constant 0 : index
    %164 = vector.load %arg6[%c0_33, %c0_34, %c0_35] : memref<2x32x128xf32, #tpu.memory_space<vmem>>, vector<1x32x128xf32>
    %165 = vector.shape_cast %164 : vector<1x32x128xf32> to vector<32x128xf32>
    %c0_36 = arith.constant 0 : index
    %c0_37 = arith.constant 0 : index
    %c0_38 = arith.constant 0 : index
    %166 = vector.load %arg7[%c0_36, %c0_37, %c0_38] : memref<2x8x128xf32, #tpu.memory_space<vmem>>, vector<1x8x128xf32>
    %167 = vector.shape_cast %166 : vector<1x8x128xf32> to vector<8x128xf32>
    %168 = vector.extract_strided_slice %163 {offsets = [0, 0], sizes = [32, 96], strides = [1, 1]} : vector<32x128xf32> to vector<32x96xf32>
    %169 = vector.extract_strided_slice %163 {offsets = [0, 96], sizes = [32, 32], strides = [1, 1]} : vector<32x128xf32> to vector<32x32xf32>
    %170 = vector.extract_strided_slice %165 {offsets = [0, 0], sizes = [32, 64], strides = [1, 1]} : vector<32x128xf32> to vector<32x64xf32>
    %171 = vector.extract_strided_slice %165 {offsets = [0, 64], sizes = [32, 64], strides = [1, 1]} : vector<32x128xf32> to vector<32x64xf32>
    %172 = vector.extract_strided_slice %167 {offsets = [0, 0], sizes = [1, 96], strides = [1, 1]} : vector<8x128xf32> to vector<1x96xf32>
    %173 = vector.extract_strided_slice %167 {offsets = [0, 96], sizes = [1, 32], strides = [1, 1]} : vector<8x128xf32> to vector<1x32xf32>
    %174 = vector.extract_strided_slice %167 {offsets = [1, 0], sizes = [1, 64], strides = [1, 1]} : vector<8x128xf32> to vector<1x64xf32>
    %175 = vector.extract_strided_slice %167 {offsets = [1, 64], sizes = [1, 32], strides = [1, 1]} : vector<8x128xf32> to vector<1x32xf32>
    %176 = vector.extract_strided_slice %167 {offsets = [2, 0], sizes = [1, 32], strides = [1, 1]} : vector<8x128xf32> to vector<1x32xf32>
    %177 = vector.extract_strided_slice %167 {offsets = [2, 32], sizes = [1, 32], strides = [1, 1]} : vector<8x128xf32> to vector<1x32xf32>
    %178 = vector.extract_strided_slice %167 {offsets = [2, 64], sizes = [1, 32], strides = [1, 1]} : vector<8x128xf32> to vector<1x32xf32>
    %179 = vector.extract_strided_slice %167 {offsets = [2, 96], sizes = [1, 32], strides = [1, 1]} : vector<8x128xf32> to vector<1x32xf32>
    %cst_39 = arith.constant dense<0.000000e+00> : vector<8x96xf32>
    %180 = tpu.matmul %161, %168, %cst_39 {dimension_numbers = #tpu.dot_dimension_numbers<[1], [0], [0], [1], [0, 0, 1, 1], [], []>} : vector<8x32xf32>, vector<32x96xf32>, vector<8x96xf32> -> vector<8x96xf32>
    %181 = vector.broadcast %172 : vector<1x96xf32> to vector<8x96xf32>
    %182 = arith.addf %180, %181 : vector<8x96xf32>
    %cst_40 = arith.constant 0.000000e+00 : f32
    %183 = vector.broadcast %cst_40 : f32 to vector<8x32xf32>
    %184 = vector.extract_strided_slice %182 {offsets = [0, 0], sizes = [8, 8], strides = [1, 1]} : vector<8x96xf32> to vector<8x8xf32>
    %cst_41 = arith.constant 0.353553385 : f32
    %185 = vector.broadcast %cst_41 : f32 to vector<8x8xf32>
    %186 = arith.mulf %184, %185 : vector<8x8xf32>
    %187 = vector.extract_strided_slice %182 {offsets = [0, 32], sizes = [8, 8], strides = [1, 1]} : vector<8x96xf32> to vector<8x8xf32>
    %188 = vector.extract_strided_slice %182 {offsets = [0, 64], sizes = [8, 8], strides = [1, 1]} : vector<8x96xf32> to vector<8x8xf32>
    %cst_42 = arith.constant dense<0.000000e+00> : vector<8x8xf32>
    %189 = tpu.matmul %186, %187, %cst_42 {dimension_numbers = #tpu.dot_dimension_numbers<[1], [1], [0], [0], [0, 0, 1, 0], [], []>} : vector<8x8xf32>, vector<8x8xf32>, vector<8x8xf32> -> vector<8x8xf32>
    %cst_43 = arith.constant dense<0xFF800000> : vector<8xf32>
    %190 = vector.multi_reduction <maximumf>, %189, %cst_43 [1] : vector<8x8xf32> to vector<8xf32>
    %191 = vector.shape_cast %190 : vector<8xf32> to vector<8x1xf32>
    %192 = vector.broadcast %191 : vector<8x1xf32> to vector<8x8xf32>
    %193 = arith.subf %189, %192 : vector<8x8xf32>
    %194 = math.exp %193 : vector<8x8xf32>
    %cst_44 = arith.constant dense<0.000000e+00> : vector<8xf32>
    %195 = vector.multi_reduction <add>, %194, %cst_44 [1] : vector<8x8xf32> to vector<8xf32>
    %196 = vector.shape_cast %195 : vector<8xf32> to vector<8x1xf32>
    %197 = tpu.reciprocal %196 {approx = true} : vector<8x1xf32> -> vector<8x1xf32>
    %198 = vector.broadcast %197 : vector<8x1xf32> to vector<8x8xf32>
    %199 = arith.mulf %194, %198 : vector<8x8xf32>
    %cst_45 = arith.constant dense<0.000000e+00> : vector<8x8xf32>
    %200 = tpu.matmul %199, %188, %cst_45 {dimension_numbers = #tpu.dot_dimension_numbers<[1], [0], [0], [1], [0, 0, 1, 1], [], []>} : vector<8x8xf32>, vector<8x8xf32>, vector<8x8xf32> -> vector<8x8xf32>
    %201 = vector.extract_strided_slice %169 {offsets = [0, 0], sizes = [8, 32], strides = [1, 1]} : vector<32x32xf32> to vector<8x32xf32>
    %cst_46 = arith.constant dense<0.000000e+00> : vector<8x32xf32>
    %202 = tpu.matmul %200, %201, %cst_46 {dimension_numbers = #tpu.dot_dimension_numbers<[1], [0], [0], [1], [0, 0, 1, 1], [], []>} : vector<8x8xf32>, vector<8x32xf32>, vector<8x32xf32> -> vector<8x32xf32>
    %203 = arith.addf %183, %202 : vector<8x32xf32>
    %204 = vector.extract_strided_slice %182 {offsets = [0, 8], sizes = [8, 8], strides = [1, 1]} : vector<8x96xf32> to vector<8x8xf32>
    %cst_47 = arith.constant 0.353553385 : f32
    %205 = vector.broadcast %cst_47 : f32 to vector<8x8xf32>
    %206 = arith.mulf %204, %205 : vector<8x8xf32>
    %207 = vector.extract_strided_slice %182 {offsets = [0, 40], sizes = [8, 8], strides = [1, 1]} : vector<8x96xf32> to vector<8x8xf32>
    %208 = vector.extract_strided_slice %182 {offsets = [0, 72], sizes = [8, 8], strides = [1, 1]} : vector<8x96xf32> to vector<8x8xf32>
    %cst_48 = arith.constant dense<0.000000e+00> : vector<8x8xf32>
    %209 = tpu.matmul %206, %207, %cst_48 {dimension_numbers = #tpu.dot_dimension_numbers<[1], [1], [0], [0], [0, 0, 1, 0], [], []>} : vector<8x8xf32>, vector<8x8xf32>, vector<8x8xf32> -> vector<8x8xf32>
    %cst_49 = arith.constant dense<0xFF800000> : vector<8xf32>
    %210 = vector.multi_reduction <maximumf>, %209, %cst_49 [1] : vector<8x8xf32> to vector<8xf32>
    %211 = vector.shape_cast %210 : vector<8xf32> to vector<8x1xf32>
    %212 = vector.broadcast %211 : vector<8x1xf32> to vector<8x8xf32>
    %213 = arith.subf %209, %212 : vector<8x8xf32>
    %214 = math.exp %213 : vector<8x8xf32>
    %cst_50 = arith.constant dense<0.000000e+00> : vector<8xf32>
    %215 = vector.multi_reduction <add>, %214, %cst_50 [1] : vector<8x8xf32> to vector<8xf32>
    %216 = vector.shape_cast %215 : vector<8xf32> to vector<8x1xf32>
    %217 = tpu.reciprocal %216 {approx = true} : vector<8x1xf32> -> vector<8x1xf32>
    %218 = vector.broadcast %217 : vector<8x1xf32> to vector<8x8xf32>
    %219 = arith.mulf %214, %218 : vector<8x8xf32>
    %cst_51 = arith.constant dense<0.000000e+00> : vector<8x8xf32>
    %220 = tpu.matmul %219, %208, %cst_51 {dimension_numbers = #tpu.dot_dimension_numbers<[1], [0], [0], [1], [0, 0, 1, 1], [], []>} : vector<8x8xf32>, vector<8x8xf32>, vector<8x8xf32> -> vector<8x8xf32>
    %221 = vector.extract_strided_slice %169 {offsets = [8, 0], sizes = [8, 32], strides = [1, 1]} : vector<32x32xf32> to vector<8x32xf32>
    %cst_52 = arith.constant dense<0.000000e+00> : vector<8x32xf32>
    %222 = tpu.matmul %220, %221, %cst_52 {dimension_numbers = #tpu.dot_dimension_numbers<[1], [0], [0], [1], [0, 0, 1, 1], [], []>} : vector<8x8xf32>, vector<8x32xf32>, vector<8x32xf32> -> vector<8x32xf32>
    %223 = arith.addf %203, %222 : vector<8x32xf32>
    %224 = vector.extract_strided_slice %182 {offsets = [0, 16], sizes = [8, 8], strides = [1, 1]} : vector<8x96xf32> to vector<8x8xf32>
    %cst_53 = arith.constant 0.353553385 : f32
    %225 = vector.broadcast %cst_53 : f32 to vector<8x8xf32>
    %226 = arith.mulf %224, %225 : vector<8x8xf32>
    %227 = vector.extract_strided_slice %182 {offsets = [0, 48], sizes = [8, 8], strides = [1, 1]} : vector<8x96xf32> to vector<8x8xf32>
    %228 = vector.extract_strided_slice %182 {offsets = [0, 80], sizes = [8, 8], strides = [1, 1]} : vector<8x96xf32> to vector<8x8xf32>
    %cst_54 = arith.constant dense<0.000000e+00> : vector<8x8xf32>
    %229 = tpu.matmul %226, %227, %cst_54 {dimension_numbers = #tpu.dot_dimension_numbers<[1], [1], [0], [0], [0, 0, 1, 0], [], []>} : vector<8x8xf32>, vector<8x8xf32>, vector<8x8xf32> -> vector<8x8xf32>
    %cst_55 = arith.constant dense<0xFF800000> : vector<8xf32>
    %230 = vector.multi_reduction <maximumf>, %229, %cst_55 [1] : vector<8x8xf32> to vector<8xf32>
    %231 = vector.shape_cast %230 : vector<8xf32> to vector<8x1xf32>
    %232 = vector.broadcast %231 : vector<8x1xf32> to vector<8x8xf32>
    %233 = arith.subf %229, %232 : vector<8x8xf32>
    %234 = math.exp %233 : vector<8x8xf32>
    %cst_56 = arith.constant dense<0.000000e+00> : vector<8xf32>
    %235 = vector.multi_reduction <add>, %234, %cst_56 [1] : vector<8x8xf32> to vector<8xf32>
    %236 = vector.shape_cast %235 : vector<8xf32> to vector<8x1xf32>
    %237 = tpu.reciprocal %236 {approx = true} : vector<8x1xf32> -> vector<8x1xf32>
    %238 = vector.broadcast %237 : vector<8x1xf32> to vector<8x8xf32>
    %239 = arith.mulf %234, %238 : vector<8x8xf32>
    %cst_57 = arith.constant dense<0.000000e+00> : vector<8x8xf32>
    %240 = tpu.matmul %239, %228, %cst_57 {dimension_numbers = #tpu.dot_dimension_numbers<[1], [0], [0], [1], [0, 0, 1, 1], [], []>} : vector<8x8xf32>, vector<8x8xf32>, vector<8x8xf32> -> vector<8x8xf32>
    %241 = vector.extract_strided_slice %169 {offsets = [16, 0], sizes = [8, 32], strides = [1, 1]} : vector<32x32xf32> to vector<8x32xf32>
    %cst_58 = arith.constant dense<0.000000e+00> : vector<8x32xf32>
    %242 = tpu.matmul %240, %241, %cst_58 {dimension_numbers = #tpu.dot_dimension_numbers<[1], [0], [0], [1], [0, 0, 1, 1], [], []>} : vector<8x8xf32>, vector<8x32xf32>, vector<8x32xf32> -> vector<8x32xf32>
    %243 = arith.addf %223, %242 : vector<8x32xf32>
    %244 = vector.extract_strided_slice %182 {offsets = [0, 24], sizes = [8, 8], strides = [1, 1]} : vector<8x96xf32> to vector<8x8xf32>
    %cst_59 = arith.constant 0.353553385 : f32
    %245 = vector.broadcast %cst_59 : f32 to vector<8x8xf32>
    %246 = arith.mulf %244, %245 : vector<8x8xf32>
    %247 = vector.extract_strided_slice %182 {offsets = [0, 56], sizes = [8, 8], strides = [1, 1]} : vector<8x96xf32> to vector<8x8xf32>
    %248 = vector.extract_strided_slice %182 {offsets = [0, 88], sizes = [8, 8], strides = [1, 1]} : vector<8x96xf32> to vector<8x8xf32>
    %cst_60 = arith.constant dense<0.000000e+00> : vector<8x8xf32>
    %249 = tpu.matmul %246, %247, %cst_60 {dimension_numbers = #tpu.dot_dimension_numbers<[1], [1], [0], [0], [0, 0, 1, 0], [], []>} : vector<8x8xf32>, vector<8x8xf32>, vector<8x8xf32> -> vector<8x8xf32>
    %cst_61 = arith.constant dense<0xFF800000> : vector<8xf32>
    %250 = vector.multi_reduction <maximumf>, %249, %cst_61 [1] : vector<8x8xf32> to vector<8xf32>
    %251 = vector.shape_cast %250 : vector<8xf32> to vector<8x1xf32>
    %252 = vector.broadcast %251 : vector<8x1xf32> to vector<8x8xf32>
    %253 = arith.subf %249, %252 : vector<8x8xf32>
    %254 = math.exp %253 : vector<8x8xf32>
    %cst_62 = arith.constant dense<0.000000e+00> : vector<8xf32>
    %255 = vector.multi_reduction <add>, %254, %cst_62 [1] : vector<8x8xf32> to vector<8xf32>
    %256 = vector.shape_cast %255 : vector<8xf32> to vector<8x1xf32>
    %257 = tpu.reciprocal %256 {approx = true} : vector<8x1xf32> -> vector<8x1xf32>
    %258 = vector.broadcast %257 : vector<8x1xf32> to vector<8x8xf32>
    %259 = arith.mulf %254, %258 : vector<8x8xf32>
    %cst_63 = arith.constant dense<0.000000e+00> : vector<8x8xf32>
    %260 = tpu.matmul %259, %248, %cst_63 {dimension_numbers = #tpu.dot_dimension_numbers<[1], [0], [0], [1], [0, 0, 1, 1], [], []>} : vector<8x8xf32>, vector<8x8xf32>, vector<8x8xf32> -> vector<8x8xf32>
    %261 = vector.extract_strided_slice %169 {offsets = [24, 0], sizes = [8, 32], strides = [1, 1]} : vector<32x32xf32> to vector<8x32xf32>
    %cst_64 = arith.constant dense<0.000000e+00> : vector<8x32xf32>
    %262 = tpu.matmul %260, %261, %cst_64 {dimension_numbers = #tpu.dot_dimension_numbers<[1], [0], [0], [1], [0, 0, 1, 1], [], []>} : vector<8x8xf32>, vector<8x32xf32>, vector<8x32xf32> -> vector<8x32xf32>
    %263 = arith.addf %243, %262 : vector<8x32xf32>
    %264 = vector.broadcast %173 : vector<1x32xf32> to vector<8x32xf32>
    %265 = arith.addf %263, %264 : vector<8x32xf32>
    %266 = arith.addf %161, %265 : vector<8x32xf32>
    %cst_65 = arith.constant dense<0.000000e+00> : vector<8xf32>
    %267 = vector.multi_reduction <add>, %266, %cst_65 [1] : vector<8x32xf32> to vector<8xf32>
    %268 = vector.shape_cast %267 : vector<8xf32> to vector<8x1xf32>
    %cst_66 = arith.constant 3.200000e+01 : f32
    %269 = vector.broadcast %cst_66 : f32 to vector<8x1xf32>
    %270 = arith.divf %268, %269 : vector<8x1xf32>
    %271 = vector.broadcast %270 : vector<8x1xf32> to vector<8x32xf32>
    %272 = arith.subf %266, %271 : vector<8x32xf32>
    %273 = arith.mulf %272, %272 : vector<8x32xf32>
    %cst_67 = arith.constant dense<0.000000e+00> : vector<8xf32>
    %274 = vector.multi_reduction <add>, %273, %cst_67 [1] : vector<8x32xf32> to vector<8xf32>
    %275 = vector.shape_cast %274 : vector<8xf32> to vector<8x1xf32>
    %cst_68 = arith.constant 3.200000e+01 : f32
    %276 = vector.broadcast %cst_68 : f32 to vector<8x1xf32>
    %277 = arith.divf %275, %276 : vector<8x1xf32>
    %cst_69 = arith.constant 9.99999974E-6 : f32
    %278 = vector.broadcast %cst_69 : f32 to vector<8x1xf32>
    %279 = arith.addf %277, %278 : vector<8x1xf32>
    %280 = math.rsqrt %279 : vector<8x1xf32>
    %281 = vector.broadcast %280 : vector<8x1xf32> to vector<8x32xf32>
    %282 = arith.mulf %272, %281 : vector<8x32xf32>
    %283 = vector.broadcast %176 : vector<1x32xf32> to vector<8x32xf32>
    %284 = arith.mulf %282, %283 : vector<8x32xf32>
    %285 = vector.broadcast %177 : vector<1x32xf32> to vector<8x32xf32>
    %286 = arith.addf %284, %285 : vector<8x32xf32>
    %cst_70 = arith.constant dense<0.000000e+00> : vector<8x64xf32>
    %287 = tpu.matmul %286, %170, %cst_70 {dimension_numbers = #tpu.dot_dimension_numbers<[1], [0], [0], [1], [0, 0, 1, 1], [], []>} : vector<8x32xf32>, vector<32x64xf32>, vector<8x64xf32> -> vector<8x64xf32>
    %288 = vector.broadcast %174 : vector<1x64xf32> to vector<8x64xf32>
    %289 = arith.addf %287, %288 : vector<8x64xf32>
    %cst_71 = arith.constant 0.000000e+00 : f32
    %290 = vector.broadcast %cst_71 : f32 to vector<8x64xf32>
    %291 = arith.maximumf %289, %290 : vector<8x64xf32>
    %cst_72 = arith.constant dense<0.000000e+00> : vector<8x32xf32>
    %292 = tpu.matmul %291, %171, %cst_72 {dimension_numbers = #tpu.dot_dimension_numbers<[1], [1], [0], [0], [0, 0, 1, 0], [], []>} : vector<8x64xf32>, vector<32x64xf32>, vector<8x32xf32> -> vector<8x32xf32>
    %293 = vector.broadcast %175 : vector<1x32xf32> to vector<8x32xf32>
    %294 = arith.addf %292, %293 : vector<8x32xf32>
    %295 = arith.addf %286, %294 : vector<8x32xf32>
    %cst_73 = arith.constant dense<0.000000e+00> : vector<8xf32>
    %296 = vector.multi_reduction <add>, %295, %cst_73 [1] : vector<8x32xf32> to vector<8xf32>
    %297 = vector.shape_cast %296 : vector<8xf32> to vector<8x1xf32>
    %cst_74 = arith.constant 3.200000e+01 : f32
    %298 = vector.broadcast %cst_74 : f32 to vector<8x1xf32>
    %299 = arith.divf %297, %298 : vector<8x1xf32>
    %300 = vector.broadcast %299 : vector<8x1xf32> to vector<8x32xf32>
    %301 = arith.subf %295, %300 : vector<8x32xf32>
    %302 = arith.mulf %301, %301 : vector<8x32xf32>
    %cst_75 = arith.constant dense<0.000000e+00> : vector<8xf32>
    %303 = vector.multi_reduction <add>, %302, %cst_75 [1] : vector<8x32xf32> to vector<8xf32>
    %304 = vector.shape_cast %303 : vector<8xf32> to vector<8x1xf32>
    %cst_76 = arith.constant 3.200000e+01 : f32
    %305 = vector.broadcast %cst_76 : f32 to vector<8x1xf32>
    %306 = arith.divf %304, %305 : vector<8x1xf32>
    %cst_77 = arith.constant 9.99999974E-6 : f32
    %307 = vector.broadcast %cst_77 : f32 to vector<8x1xf32>
    %308 = arith.addf %306, %307 : vector<8x1xf32>
    %309 = math.rsqrt %308 : vector<8x1xf32>
    %310 = vector.broadcast %309 : vector<8x1xf32> to vector<8x32xf32>
    %311 = arith.mulf %301, %310 : vector<8x32xf32>
    %312 = vector.broadcast %178 : vector<1x32xf32> to vector<8x32xf32>
    %313 = arith.mulf %311, %312 : vector<8x32xf32>
    %314 = vector.broadcast %179 : vector<1x32xf32> to vector<8x32xf32>
    %315 = arith.addf %313, %314 : vector<8x32xf32>
    %c1 = arith.constant 1 : index
    %c0_78 = arith.constant 0 : index
    %c0_79 = arith.constant 0 : index
    %316 = vector.load %arg5[%c1, %c0_78, %c0_79] : memref<2x32x128xf32, #tpu.memory_space<vmem>>, vector<1x32x128xf32>
    %317 = vector.shape_cast %316 : vector<1x32x128xf32> to vector<32x128xf32>
    %c1_80 = arith.constant 1 : index
    %c0_81 = arith.constant 0 : index
    %c0_82 = arith.constant 0 : index
    %318 = vector.load %arg6[%c1_80, %c0_81, %c0_82] : memref<2x32x128xf32, #tpu.memory_space<vmem>>, vector<1x32x128xf32>
    %319 = vector.shape_cast %318 : vector<1x32x128xf32> to vector<32x128xf32>
    %c1_83 = arith.constant 1 : index
    %c0_84 = arith.constant 0 : index
    %c0_85 = arith.constant 0 : index
    %320 = vector.load %arg7[%c1_83, %c0_84, %c0_85] : memref<2x8x128xf32, #tpu.memory_space<vmem>>, vector<1x8x128xf32>
    %321 = vector.shape_cast %320 : vector<1x8x128xf32> to vector<8x128xf32>
    %322 = vector.extract_strided_slice %317 {offsets = [0, 0], sizes = [32, 96], strides = [1, 1]} : vector<32x128xf32> to vector<32x96xf32>
    %323 = vector.extract_strided_slice %317 {offsets = [0, 96], sizes = [32, 32], strides = [1, 1]} : vector<32x128xf32> to vector<32x32xf32>
    %324 = vector.extract_strided_slice %319 {offsets = [0, 0], sizes = [32, 64], strides = [1, 1]} : vector<32x128xf32> to vector<32x64xf32>
    %325 = vector.extract_strided_slice %319 {offsets = [0, 64], sizes = [32, 64], strides = [1, 1]} : vector<32x128xf32> to vector<32x64xf32>
    %326 = vector.extract_strided_slice %321 {offsets = [0, 0], sizes = [1, 96], strides = [1, 1]} : vector<8x128xf32> to vector<1x96xf32>
    %327 = vector.extract_strided_slice %321 {offsets = [0, 96], sizes = [1, 32], strides = [1, 1]} : vector<8x128xf32> to vector<1x32xf32>
    %328 = vector.extract_strided_slice %321 {offsets = [1, 0], sizes = [1, 64], strides = [1, 1]} : vector<8x128xf32> to vector<1x64xf32>
    %329 = vector.extract_strided_slice %321 {offsets = [1, 64], sizes = [1, 32], strides = [1, 1]} : vector<8x128xf32> to vector<1x32xf32>
    %330 = vector.extract_strided_slice %321 {offsets = [2, 0], sizes = [1, 32], strides = [1, 1]} : vector<8x128xf32> to vector<1x32xf32>
    %331 = vector.extract_strided_slice %321 {offsets = [2, 32], sizes = [1, 32], strides = [1, 1]} : vector<8x128xf32> to vector<1x32xf32>
    %332 = vector.extract_strided_slice %321 {offsets = [2, 64], sizes = [1, 32], strides = [1, 1]} : vector<8x128xf32> to vector<1x32xf32>
    %333 = vector.extract_strided_slice %321 {offsets = [2, 96], sizes = [1, 32], strides = [1, 1]} : vector<8x128xf32> to vector<1x32xf32>
    %cst_86 = arith.constant dense<0.000000e+00> : vector<8x96xf32>
    %334 = tpu.matmul %315, %322, %cst_86 {dimension_numbers = #tpu.dot_dimension_numbers<[1], [0], [0], [1], [0, 0, 1, 1], [], []>} : vector<8x32xf32>, vector<32x96xf32>, vector<8x96xf32> -> vector<8x96xf32>
    %335 = vector.broadcast %326 : vector<1x96xf32> to vector<8x96xf32>
    %336 = arith.addf %334, %335 : vector<8x96xf32>
    %cst_87 = arith.constant 0.000000e+00 : f32
    %337 = vector.broadcast %cst_87 : f32 to vector<8x32xf32>
    %338 = vector.extract_strided_slice %336 {offsets = [0, 0], sizes = [8, 8], strides = [1, 1]} : vector<8x96xf32> to vector<8x8xf32>
    %cst_88 = arith.constant 0.353553385 : f32
    %339 = vector.broadcast %cst_88 : f32 to vector<8x8xf32>
    %340 = arith.mulf %338, %339 : vector<8x8xf32>
    %341 = vector.extract_strided_slice %336 {offsets = [0, 32], sizes = [8, 8], strides = [1, 1]} : vector<8x96xf32> to vector<8x8xf32>
    %342 = vector.extract_strided_slice %336 {offsets = [0, 64], sizes = [8, 8], strides = [1, 1]} : vector<8x96xf32> to vector<8x8xf32>
    %cst_89 = arith.constant dense<0.000000e+00> : vector<8x8xf32>
    %343 = tpu.matmul %340, %341, %cst_89 {dimension_numbers = #tpu.dot_dimension_numbers<[1], [1], [0], [0], [0, 0, 1, 0], [], []>} : vector<8x8xf32>, vector<8x8xf32>, vector<8x8xf32> -> vector<8x8xf32>
    %cst_90 = arith.constant dense<0xFF800000> : vector<8xf32>
    %344 = vector.multi_reduction <maximumf>, %343, %cst_90 [1] : vector<8x8xf32> to vector<8xf32>
    %345 = vector.shape_cast %344 : vector<8xf32> to vector<8x1xf32>
    %346 = vector.broadcast %345 : vector<8x1xf32> to vector<8x8xf32>
    %347 = arith.subf %343, %346 : vector<8x8xf32>
    %348 = math.exp %347 : vector<8x8xf32>
    %cst_91 = arith.constant dense<0.000000e+00> : vector<8xf32>
    %349 = vector.multi_reduction <add>, %348, %cst_91 [1] : vector<8x8xf32> to vector<8xf32>
    %350 = vector.shape_cast %349 : vector<8xf32> to vector<8x1xf32>
    %351 = tpu.reciprocal %350 {approx = true} : vector<8x1xf32> -> vector<8x1xf32>
    %352 = vector.broadcast %351 : vector<8x1xf32> to vector<8x8xf32>
    %353 = arith.mulf %348, %352 : vector<8x8xf32>
    %cst_92 = arith.constant dense<0.000000e+00> : vector<8x8xf32>
    %354 = tpu.matmul %353, %342, %cst_92 {dimension_numbers = #tpu.dot_dimension_numbers<[1], [0], [0], [1], [0, 0, 1, 1], [], []>} : vector<8x8xf32>, vector<8x8xf32>, vector<8x8xf32> -> vector<8x8xf32>
    %355 = vector.extract_strided_slice %323 {offsets = [0, 0], sizes = [8, 32], strides = [1, 1]} : vector<32x32xf32> to vector<8x32xf32>
    %cst_93 = arith.constant dense<0.000000e+00> : vector<8x32xf32>
    %356 = tpu.matmul %354, %355, %cst_93 {dimension_numbers = #tpu.dot_dimension_numbers<[1], [0], [0], [1], [0, 0, 1, 1], [], []>} : vector<8x8xf32>, vector<8x32xf32>, vector<8x32xf32> -> vector<8x32xf32>
    %357 = arith.addf %337, %356 : vector<8x32xf32>
    %358 = vector.extract_strided_slice %336 {offsets = [0, 8], sizes = [8, 8], strides = [1, 1]} : vector<8x96xf32> to vector<8x8xf32>
    %cst_94 = arith.constant 0.353553385 : f32
    %359 = vector.broadcast %cst_94 : f32 to vector<8x8xf32>
    %360 = arith.mulf %358, %359 : vector<8x8xf32>
    %361 = vector.extract_strided_slice %336 {offsets = [0, 40], sizes = [8, 8], strides = [1, 1]} : vector<8x96xf32> to vector<8x8xf32>
    %362 = vector.extract_strided_slice %336 {offsets = [0, 72], sizes = [8, 8], strides = [1, 1]} : vector<8x96xf32> to vector<8x8xf32>
    %cst_95 = arith.constant dense<0.000000e+00> : vector<8x8xf32>
    %363 = tpu.matmul %360, %361, %cst_95 {dimension_numbers = #tpu.dot_dimension_numbers<[1], [1], [0], [0], [0, 0, 1, 0], [], []>} : vector<8x8xf32>, vector<8x8xf32>, vector<8x8xf32> -> vector<8x8xf32>
    %cst_96 = arith.constant dense<0xFF800000> : vector<8xf32>
    %364 = vector.multi_reduction <maximumf>, %363, %cst_96 [1] : vector<8x8xf32> to vector<8xf32>
    %365 = vector.shape_cast %364 : vector<8xf32> to vector<8x1xf32>
    %366 = vector.broadcast %365 : vector<8x1xf32> to vector<8x8xf32>
    %367 = arith.subf %363, %366 : vector<8x8xf32>
    %368 = math.exp %367 : vector<8x8xf32>
    %cst_97 = arith.constant dense<0.000000e+00> : vector<8xf32>
    %369 = vector.multi_reduction <add>, %368, %cst_97 [1] : vector<8x8xf32> to vector<8xf32>
    %370 = vector.shape_cast %369 : vector<8xf32> to vector<8x1xf32>
    %371 = tpu.reciprocal %370 {approx = true} : vector<8x1xf32> -> vector<8x1xf32>
    %372 = vector.broadcast %371 : vector<8x1xf32> to vector<8x8xf32>
    %373 = arith.mulf %368, %372 : vector<8x8xf32>
    %cst_98 = arith.constant dense<0.000000e+00> : vector<8x8xf32>
    %374 = tpu.matmul %373, %362, %cst_98 {dimension_numbers = #tpu.dot_dimension_numbers<[1], [0], [0], [1], [0, 0, 1, 1], [], []>} : vector<8x8xf32>, vector<8x8xf32>, vector<8x8xf32> -> vector<8x8xf32>
    %375 = vector.extract_strided_slice %323 {offsets = [8, 0], sizes = [8, 32], strides = [1, 1]} : vector<32x32xf32> to vector<8x32xf32>
    %cst_99 = arith.constant dense<0.000000e+00> : vector<8x32xf32>
    %376 = tpu.matmul %374, %375, %cst_99 {dimension_numbers = #tpu.dot_dimension_numbers<[1], [0], [0], [1], [0, 0, 1, 1], [], []>} : vector<8x8xf32>, vector<8x32xf32>, vector<8x32xf32> -> vector<8x32xf32>
    %377 = arith.addf %357, %376 : vector<8x32xf32>
    %378 = vector.extract_strided_slice %336 {offsets = [0, 16], sizes = [8, 8], strides = [1, 1]} : vector<8x96xf32> to vector<8x8xf32>
    %cst_100 = arith.constant 0.353553385 : f32
    %379 = vector.broadcast %cst_100 : f32 to vector<8x8xf32>
    %380 = arith.mulf %378, %379 : vector<8x8xf32>
    %381 = vector.extract_strided_slice %336 {offsets = [0, 48], sizes = [8, 8], strides = [1, 1]} : vector<8x96xf32> to vector<8x8xf32>
    %382 = vector.extract_strided_slice %336 {offsets = [0, 80], sizes = [8, 8], strides = [1, 1]} : vector<8x96xf32> to vector<8x8xf32>
    %cst_101 = arith.constant dense<0.000000e+00> : vector<8x8xf32>
    %383 = tpu.matmul %380, %381, %cst_101 {dimension_numbers = #tpu.dot_dimension_numbers<[1], [1], [0], [0], [0, 0, 1, 0], [], []>} : vector<8x8xf32>, vector<8x8xf32>, vector<8x8xf32> -> vector<8x8xf32>
    %cst_102 = arith.constant dense<0xFF800000> : vector<8xf32>
    %384 = vector.multi_reduction <maximumf>, %383, %cst_102 [1] : vector<8x8xf32> to vector<8xf32>
    %385 = vector.shape_cast %384 : vector<8xf32> to vector<8x1xf32>
    %386 = vector.broadcast %385 : vector<8x1xf32> to vector<8x8xf32>
    %387 = arith.subf %383, %386 : vector<8x8xf32>
    %388 = math.exp %387 : vector<8x8xf32>
    %cst_103 = arith.constant dense<0.000000e+00> : vector<8xf32>
    %389 = vector.multi_reduction <add>, %388, %cst_103 [1] : vector<8x8xf32> to vector<8xf32>
    %390 = vector.shape_cast %389 : vector<8xf32> to vector<8x1xf32>
    %391 = tpu.reciprocal %390 {approx = true} : vector<8x1xf32> -> vector<8x1xf32>
    %392 = vector.broadcast %391 : vector<8x1xf32> to vector<8x8xf32>
    %393 = arith.mulf %388, %392 : vector<8x8xf32>
    %cst_104 = arith.constant dense<0.000000e+00> : vector<8x8xf32>
    %394 = tpu.matmul %393, %382, %cst_104 {dimension_numbers = #tpu.dot_dimension_numbers<[1], [0], [0], [1], [0, 0, 1, 1], [], []>} : vector<8x8xf32>, vector<8x8xf32>, vector<8x8xf32> -> vector<8x8xf32>
    %395 = vector.extract_strided_slice %323 {offsets = [16, 0], sizes = [8, 32], strides = [1, 1]} : vector<32x32xf32> to vector<8x32xf32>
    %cst_105 = arith.constant dense<0.000000e+00> : vector<8x32xf32>
    %396 = tpu.matmul %394, %395, %cst_105 {dimension_numbers = #tpu.dot_dimension_numbers<[1], [0], [0], [1], [0, 0, 1, 1], [], []>} : vector<8x8xf32>, vector<8x32xf32>, vector<8x32xf32> -> vector<8x32xf32>
    %397 = arith.addf %377, %396 : vector<8x32xf32>
    %398 = vector.extract_strided_slice %336 {offsets = [0, 24], sizes = [8, 8], strides = [1, 1]} : vector<8x96xf32> to vector<8x8xf32>
    %cst_106 = arith.constant 0.353553385 : f32
    %399 = vector.broadcast %cst_106 : f32 to vector<8x8xf32>
    %400 = arith.mulf %398, %399 : vector<8x8xf32>
    %401 = vector.extract_strided_slice %336 {offsets = [0, 56], sizes = [8, 8], strides = [1, 1]} : vector<8x96xf32> to vector<8x8xf32>
    %402 = vector.extract_strided_slice %336 {offsets = [0, 88], sizes = [8, 8], strides = [1, 1]} : vector<8x96xf32> to vector<8x8xf32>
    %cst_107 = arith.constant dense<0.000000e+00> : vector<8x8xf32>
    %403 = tpu.matmul %400, %401, %cst_107 {dimension_numbers = #tpu.dot_dimension_numbers<[1], [1], [0], [0], [0, 0, 1, 0], [], []>} : vector<8x8xf32>, vector<8x8xf32>, vector<8x8xf32> -> vector<8x8xf32>
    %cst_108 = arith.constant dense<0xFF800000> : vector<8xf32>
    %404 = vector.multi_reduction <maximumf>, %403, %cst_108 [1] : vector<8x8xf32> to vector<8xf32>
    %405 = vector.shape_cast %404 : vector<8xf32> to vector<8x1xf32>
    %406 = vector.broadcast %405 : vector<8x1xf32> to vector<8x8xf32>
    %407 = arith.subf %403, %406 : vector<8x8xf32>
    %408 = math.exp %407 : vector<8x8xf32>
    %cst_109 = arith.constant dense<0.000000e+00> : vector<8xf32>
    %409 = vector.multi_reduction <add>, %408, %cst_109 [1] : vector<8x8xf32> to vector<8xf32>
    %410 = vector.shape_cast %409 : vector<8xf32> to vector<8x1xf32>
    %411 = tpu.reciprocal %410 {approx = true} : vector<8x1xf32> -> vector<8x1xf32>
    %412 = vector.broadcast %411 : vector<8x1xf32> to vector<8x8xf32>
    %413 = arith.mulf %408, %412 : vector<8x8xf32>
    %cst_110 = arith.constant dense<0.000000e+00> : vector<8x8xf32>
    %414 = tpu.matmul %413, %402, %cst_110 {dimension_numbers = #tpu.dot_dimension_numbers<[1], [0], [0], [1], [0, 0, 1, 1], [], []>} : vector<8x8xf32>, vector<8x8xf32>, vector<8x8xf32> -> vector<8x8xf32>
    %415 = vector.extract_strided_slice %323 {offsets = [24, 0], sizes = [8, 32], strides = [1, 1]} : vector<32x32xf32> to vector<8x32xf32>
    %cst_111 = arith.constant dense<0.000000e+00> : vector<8x32xf32>
    %416 = tpu.matmul %414, %415, %cst_111 {dimension_numbers = #tpu.dot_dimension_numbers<[1], [0], [0], [1], [0, 0, 1, 1], [], []>} : vector<8x8xf32>, vector<8x32xf32>, vector<8x32xf32> -> vector<8x32xf32>
    %417 = arith.addf %397, %416 : vector<8x32xf32>
    %418 = vector.broadcast %327 : vector<1x32xf32> to vector<8x32xf32>
    %419 = arith.addf %417, %418 : vector<8x32xf32>
    %420 = arith.addf %315, %419 : vector<8x32xf32>
    %cst_112 = arith.constant dense<0.000000e+00> : vector<8xf32>
    %421 = vector.multi_reduction <add>, %420, %cst_112 [1] : vector<8x32xf32> to vector<8xf32>
    %422 = vector.shape_cast %421 : vector<8xf32> to vector<8x1xf32>
    %cst_113 = arith.constant 3.200000e+01 : f32
    %423 = vector.broadcast %cst_113 : f32 to vector<8x1xf32>
    %424 = arith.divf %422, %423 : vector<8x1xf32>
    %425 = vector.broadcast %424 : vector<8x1xf32> to vector<8x32xf32>
    %426 = arith.subf %420, %425 : vector<8x32xf32>
    %427 = arith.mulf %426, %426 : vector<8x32xf32>
    %cst_114 = arith.constant dense<0.000000e+00> : vector<8xf32>
    %428 = vector.multi_reduction <add>, %427, %cst_114 [1] : vector<8x32xf32> to vector<8xf32>
    %429 = vector.shape_cast %428 : vector<8xf32> to vector<8x1xf32>
    %cst_115 = arith.constant 3.200000e+01 : f32
    %430 = vector.broadcast %cst_115 : f32 to vector<8x1xf32>
    %431 = arith.divf %429, %430 : vector<8x1xf32>
    %cst_116 = arith.constant 9.99999974E-6 : f32
    %432 = vector.broadcast %cst_116 : f32 to vector<8x1xf32>
    %433 = arith.addf %431, %432 : vector<8x1xf32>
    %434 = math.rsqrt %433 : vector<8x1xf32>
    %435 = vector.broadcast %434 : vector<8x1xf32> to vector<8x32xf32>
    %436 = arith.mulf %426, %435 : vector<8x32xf32>
    %437 = vector.broadcast %330 : vector<1x32xf32> to vector<8x32xf32>
    %438 = arith.mulf %436, %437 : vector<8x32xf32>
    %439 = vector.broadcast %331 : vector<1x32xf32> to vector<8x32xf32>
    %440 = arith.addf %438, %439 : vector<8x32xf32>
    %cst_117 = arith.constant dense<0.000000e+00> : vector<8x64xf32>
    %441 = tpu.matmul %440, %324, %cst_117 {dimension_numbers = #tpu.dot_dimension_numbers<[1], [0], [0], [1], [0, 0, 1, 1], [], []>} : vector<8x32xf32>, vector<32x64xf32>, vector<8x64xf32> -> vector<8x64xf32>
    %442 = vector.broadcast %328 : vector<1x64xf32> to vector<8x64xf32>
    %443 = arith.addf %441, %442 : vector<8x64xf32>
    %cst_118 = arith.constant 0.000000e+00 : f32
    %444 = vector.broadcast %cst_118 : f32 to vector<8x64xf32>
    %445 = arith.maximumf %443, %444 : vector<8x64xf32>
    %cst_119 = arith.constant dense<0.000000e+00> : vector<8x32xf32>
    %446 = tpu.matmul %445, %325, %cst_119 {dimension_numbers = #tpu.dot_dimension_numbers<[1], [1], [0], [0], [0, 0, 1, 0], [], []>} : vector<8x64xf32>, vector<32x64xf32>, vector<8x32xf32> -> vector<8x32xf32>
    %447 = vector.broadcast %329 : vector<1x32xf32> to vector<8x32xf32>
    %448 = arith.addf %446, %447 : vector<8x32xf32>
    %449 = arith.addf %440, %448 : vector<8x32xf32>
    %cst_120 = arith.constant dense<0.000000e+00> : vector<8xf32>
    %450 = vector.multi_reduction <add>, %449, %cst_120 [1] : vector<8x32xf32> to vector<8xf32>
    %451 = vector.shape_cast %450 : vector<8xf32> to vector<8x1xf32>
    %cst_121 = arith.constant 3.200000e+01 : f32
    %452 = vector.broadcast %cst_121 : f32 to vector<8x1xf32>
    %453 = arith.divf %451, %452 : vector<8x1xf32>
    %454 = vector.broadcast %453 : vector<8x1xf32> to vector<8x32xf32>
    %455 = arith.subf %449, %454 : vector<8x32xf32>
    %456 = arith.mulf %455, %455 : vector<8x32xf32>
    %cst_122 = arith.constant dense<0.000000e+00> : vector<8xf32>
    %457 = vector.multi_reduction <add>, %456, %cst_122 [1] : vector<8x32xf32> to vector<8xf32>
    %458 = vector.shape_cast %457 : vector<8xf32> to vector<8x1xf32>
    %cst_123 = arith.constant 3.200000e+01 : f32
    %459 = vector.broadcast %cst_123 : f32 to vector<8x1xf32>
    %460 = arith.divf %458, %459 : vector<8x1xf32>
    %cst_124 = arith.constant 9.99999974E-6 : f32
    %461 = vector.broadcast %cst_124 : f32 to vector<8x1xf32>
    %462 = arith.addf %460, %461 : vector<8x1xf32>
    %463 = math.rsqrt %462 : vector<8x1xf32>
    %464 = vector.broadcast %463 : vector<8x1xf32> to vector<8x32xf32>
    %465 = arith.mulf %455, %464 : vector<8x32xf32>
    %466 = vector.broadcast %332 : vector<1x32xf32> to vector<8x32xf32>
    %467 = arith.mulf %465, %466 : vector<8x32xf32>
    %468 = vector.broadcast %333 : vector<1x32xf32> to vector<8x32xf32>
    %469 = arith.addf %467, %468 : vector<8x32xf32>
    %c0_125 = arith.constant 0 : index
    %c0_126 = arith.constant 0 : index
    %470 = vector.load %arg8[%c0_125, %c0_126] : memref<35x64xf32, #tpu.memory_space<vmem>>, vector<35x64xf32>
    %cst_127 = arith.constant dense<0.000000e+00> : vector<32xf32>
    %471 = vector.multi_reduction <add>, %469, %cst_127 [0] : vector<8x32xf32> to vector<32xf32>
    %472 = vector.shape_cast %471 : vector<32xf32> to vector<1x32xf32>
    %cst_128 = arith.constant 8.000000e+00 : f32
    %473 = vector.broadcast %cst_128 : f32 to vector<1x32xf32>
    %474 = arith.divf %472, %473 : vector<1x32xf32>
    %475 = vector.extract_strided_slice %470 {offsets = [0, 0], sizes = [32, 64], strides = [1, 1]} : vector<35x64xf32> to vector<32x64xf32>
    %476 = vector.extract_strided_slice %470 {offsets = [32, 0], sizes = [1, 64], strides = [1, 1]} : vector<35x64xf32> to vector<1x64xf32>
    %477 = vector.extract_strided_slice %470 {offsets = [33, 0], sizes = [1, 64], strides = [1, 1]} : vector<35x64xf32> to vector<1x64xf32>
    %478 = vector.extract_strided_slice %470 {offsets = [34, 0], sizes = [1, 1], strides = [1, 1]} : vector<35x64xf32> to vector<1x1xf32>
    %cst_129 = arith.constant dense<0.000000e+00> : vector<1x64xf32>
    %479 = tpu.matmul %474, %475, %cst_129 {dimension_numbers = #tpu.dot_dimension_numbers<[1], [0], [0], [1], [0, 0, 1, 1], [], []>} : vector<1x32xf32>, vector<32x64xf32>, vector<1x64xf32> -> vector<1x64xf32>
    %480 = arith.addf %479, %476 : vector<1x64xf32>
    %cst_130 = arith.constant 5.000000e-01 : f32
    %481 = vector.broadcast %cst_130 : f32 to vector<1x64xf32>
    %482 = arith.mulf %481, %480 : vector<1x64xf32>
    %cst_131 = arith.constant 0.707106769 : f32
    %483 = vector.broadcast %cst_131 : f32 to vector<1x64xf32>
    %484 = arith.mulf %480, %483 : vector<1x64xf32>
    %485 = math.erf %484 : vector<1x64xf32>
    %cst_132 = arith.constant 1.000000e+00 : f32
    %486 = vector.broadcast %cst_132 : f32 to vector<1x64xf32>
    %487 = arith.addf %486, %485 : vector<1x64xf32>
    %488 = arith.mulf %482, %487 : vector<1x64xf32>
    %489 = arith.mulf %488, %477 : vector<1x64xf32>
    %cst_133 = arith.constant dense<0.000000e+00> : vector<1xf32>
    %490 = vector.multi_reduction <add>, %489, %cst_133 [1] : vector<1x64xf32> to vector<1xf32>
    %491 = vector.shape_cast %490 : vector<1xf32> to vector<1x1xf32>
    %492 = arith.addf %491, %478 : vector<1x1xf32>
    %c0_134 = arith.constant 0 : index
    %c0_135 = arith.constant 0 : index
    %c0_136 = arith.constant 0 : index
    %493 = vector.load %arg9[%c0_134, %c0_135, %c0_136] : memref<1x1x1xf32, #tpu.memory_space<vmem>>, vector<1x1x1xf32>
    %494 = vector.shape_cast %493 : vector<1x1x1xf32> to vector<1x1xf32>
    %495 = vector.shape_cast %492 : vector<1x1xf32> to vector<1x1x1xf32>
    tpu.vector_store %arg9[%c0_134, %c0_135, %c0_136], %495 {strides = array<i32>} : memref<1x1x1xf32, #tpu.memory_space<vmem>>, vector<1x1x1xf32>,
    return
  }
  func.func @transform_0(%arg0: i32) -> (i32, i32, i32) {
    %c0_i32 = arith.constant 0 : i32
    %c0_i32_0 = arith.constant 0 : i32
    %c0_i32_1 = arith.constant 0 : i32
    return %arg0, %c0_i32, %c0_i32_0 : i32, i32, i32
  }
  func.func @transform_1(%arg0: i32) -> (i32, i32, i32) {
    %c0_i32 = arith.constant 0 : i32
    %c0_i32_0 = arith.constant 0 : i32
    %c0_i32_1 = arith.constant 0 : i32
    return %arg0, %c0_i32, %c0_i32_0 : i32, i32, i32
  }
  func.func @transform_2(%arg0: i32) -> (i32, i32, i32) {
    %c0_i32 = arith.constant 0 : i32
    %c0_i32_0 = arith.constant 0 : i32
    %c0_i32_1 = arith.constant 0 : i32
    return %arg0, %c0_i32, %c0_i32_0 : i32, i32, i32
  }
  func.func @transform_3(%arg0: i32) -> (i32, i32) {
    %c0_i32 = arith.constant 0 : i32
    %c0_i32_0 = arith.constant 0 : i32
    %c0_i32_1 = arith.constant 0 : i32
    return %c0_i32, %c0_i32_0 : i32, i32
  }
  func.func @transform_4(%arg0: i32) -> (i32, i32, i32) {
    %c0_i32 = arith.constant 0 : i32
    %c0_i32_0 = arith.constant 0 : i32
    %c0_i32_1 = arith.constant 0 : i32
    %c0_i32_2 = arith.constant 0 : i32
    return %c0_i32, %c0_i32_0, %c0_i32_1 : i32, i32, i32
  }
  func.func @transform_5(%arg0: i32) -> (i32, i32, i32) {
    %c0_i32 = arith.constant 0 : i32
    %c0_i32_0 = arith.constant 0 : i32
    %c0_i32_1 = arith.constant 0 : i32
    %c0_i32_2 = arith.constant 0 : i32
    return %c0_i32, %c0_i32_0, %c0_i32_1 : i32, i32, i32
  }
  func.func @transform_6(%arg0: i32) -> (i32, i32, i32) {
    %c0_i32 = arith.constant 0 : i32
    %c0_i32_0 = arith.constant 0 : i32
    %c0_i32_1 = arith.constant 0 : i32
    %c0_i32_2 = arith.constant 0 : i32
    return %c0_i32, %c0_i32_0, %c0_i32_1 : i32, i32, i32
  }
  func.func @transform_7(%arg0: i32) -> (i32, i32) {
    %c0_i32 = arith.constant 0 : i32
    %c0_i32_0 = arith.constant 0 : i32
    %c0_i32_1 = arith.constant 0 : i32
    return %c0_i32, %c0_i32_0 : i32, i32
  }
  func.func @transform_8(%arg0: i32) -> (i32, i32, i32) {
    %c0_i32 = arith.constant 0 : i32
    %c0_i32_0 = arith.constant 0 : i32
    %c0_i32_1 = arith.constant 0 : i32
    return %arg0, %c0_i32, %c0_i32_0 : i32, i32, i32
  }
}

</mosaic_0001>

<bundles_post_ra>
// kernel: multimod_alberto_forward.1
= control target key start
LH: loop header
LB: loop body
LE: loop exit
PB: predicated region body
PF: predicated region fallthrough
CT: control target
= control target key end

     0   :  { %13 = vsyncpa [#allocation3], 0  ;;  %s5446_s0 = inlined_call_operand.vmem [shape: s32[2,8,128], index: 0, kind: input, shape index: {}]   ;;  %s5447_s1 = inlined_call_operand.vmem [shape: f32[2,8,128], index: 1, kind: input, shape index: {}]   ;;  %s5448_s2 = inlined_call_operand.hbm [shape: f32[2,1,32], index: 2, kind: input, shape index: {}]   ;;  %s5449_s3 = inlined_call_operand.hbm [shape: f32[32,128], index: 3, kind: input, shape index: {}]   ;;  %s5450_s4 = inlined_call_operand.vmem [shape: f32[2,32,128], index: 4, kind: input, shape index: {}]   ;;  %s5451_s5 = inlined_call_operand.hbm [shape: f32[2,32,128], index: 5, kind: input, shape index: {}]   ;;  %s5452_s6 = inlined_call_operand.hbm [shape: f32[2,8,128], index: 6, kind: input, shape index: {}]   ;;  %s5453_s7 = inlined_call_operand.hbm [shape: f32[35,64], index: 7, kind: input, shape index: {}]   ;;  %s5454_s8 = inlined_call_operand.vmem [shape: f32[2,1,1], index: 8, kind: output, shape index: {}]  }
   0x1   :  { %15 = vsyncpa [#allocation3 + $0x1], 0 }
   0x2   :  { %16 = vsyncpa [#allocation5], 0 }
   0x3   :  { %17 = vsyncpa [#allocation8], 0  ;;  %s4758_s27 = smov 0   ;;  %s4760_s28 = smov 0  }
   0x4   :  { %s4762_s29 = smov 0   ;;  %s4764_s30 = smov 0  }
   0x5 LB: > { %s4690_s9 = smov [#allocation4]   ;;  %s4779_s11 = sadd.s32 4294967295, %s4688_s30   ;;  %s4688_s30 = sphi %s4764_s30, %s5473_s30   ;;  %s4684_s29 = sphi %s4762_s29, %s5472_s29   ;;  %s4680_s28 = sphi %s4760_s28, %s5471_s28   ;;  %s4676_s27 = sphi %s4758_s27, %s5470_s27  }
   0x6   : > { %s249_s10 = sshll.u32 %s4690_s9, 4  ;;  %p3926_p0 = scmp.ge.s32.totalorder %s4688_s30, 1  ;;  %s250_s10 = int_to_ptr.vmem [resolvable:$true] %s249_s10 }
   0x7   : > { %p5455_p1 = scmp.eq.s32.totalorder %s4779_s11, 0  ;;  %p237_p2 = scmp.lt.s32.totalorder %s4688_s30, 3 }
   0x8   : > { %s4691_s13 = smov [#allocation7]   ;;  %s4692_s16 = smov [#allocation6]  }
   0x9   : > { %p4784_p3 = pnand %p3926_p0, %p237_p2  ;;  %s278_s14 = sshll.u32 %s4691_s13, 4  ;;  %s4796_s14 = int_to_ptr.vmem [resolvable:$true] %s278_s14 }
   0xa   : > { %s265_s17 = sshll.u32 %s4692_s16, 4  ;;  %s4525_s18 = scalar_lea.vmem %s250_s10, 512  ;;  %s4798_s17 = int_to_ptr.vmem [resolvable:$true] %s265_s17 }
   0xb   : > { %s5459_s12 = scalar_select %p4784_p3, 1, 0 }
   0xc   : > { %p4387_p4 = pneg %p4784_p3  ;;  %p4526_p7 = scmp.ne.s32.totalorder %s250_s10, %s4525_s18 }
   0xd   : > { %p4533_p10 = scmp.lt.s32.totalorder %s250_s10, %s250_s10  ;;  %p4534_p11 = scmp.lt.s32.totalorder %s4525_s18, %s4525_s18 }
   0xe   : > { %p4792_p5 = pnand %p4387_p4, %p5455_p1 }
   0xf   : > { %p4535_p12 = por %p4534_p11, %p4533_p10 }
  0x10   : > { %p4516_p6 = pneg %p4792_p5 }
  0x12   : > { %p4528_p8 = pnand %p4526_p7, %p4516_p6 }
  0x14   : > { %p4529_p9 = pneg %p4528_p8 }
  0x16   : > { %p4536_p13 = pnand %p4535_p12, %p4529_p9 }
  0x18   : > { %4539 = shalt.err (!%p4536_p13)
}
  0x19   : > { %s4693_s19 = smov 128   ;;  %s4694_s20 = smov 8  }
  0x1a   : > { %4390 = dma.hbm_to_vmem [thread:$0]  (!%p4792_p5), %s5449_s3, 512, %s250_s10, [#allocation5], %s4693_s19, %s4693_s19, %s4694_s20  }
  0x1b   : > { %s4551_s23 = scalar_lea.vmem %s4796_s14, 256  ;;  %p4559_p7 = scmp.lt.s32.totalorder %s4796_s14, %s4796_s14 }
  0x1c   : > { %p4552_p0 = scmp.ne.s32.totalorder %s4796_s14, %s4551_s23  ;;  %p4560_p8 = scmp.lt.s32.totalorder %s4551_s23, %s4551_s23 }
  0x1e   : > { %p4554_p2 = pnand %p4552_p0, %p4516_p6  ;;  %p4561_p9 = por %p4560_p8, %p4559_p7 }
  0x20   : > { %p4555_p4 = pneg %p4554_p2 }
  0x22   : > { %p4562_p10 = pnand %p4561_p9, %p4555_p4 }
  0x24   : > { %4565 = shalt.err (!%p4562_p10)
}
  0x25   : > { %4396 = dma.hbm_to_vmem [thread:$0]  (!%p4792_p5), %s5452_s6, 256, %s4796_s14, [#allocation8], %s4693_s19, %s4693_s19, %s4694_s20  }
  0x26   : > { %s4577_s26 = scalar_lea.vmem %s4798_s17, 1024  ;;  %p4585_p0 = scmp.lt.s32.totalorder %s4798_s17, %s4798_s17 }
  0x27   : > { %p4578_p11 = scmp.ne.s32.totalorder %s4798_s17, %s4577_s26  ;;  %p4586_p2 = scmp.lt.s32.totalorder %s4577_s26, %s4577_s26 }
  0x29   : > { %p4580_p12 = pnand %p4578_p11, %p4516_p6  ;;  %p4587_p4 = por %p4586_p2, %p4585_p0 }
  0x2b   : > { %p4581_p13 = pneg %p4580_p12 }
  0x2d   : > { %p4588_p7 = pnand %p4587_p4, %p4581_p13 }
  0x2f   : > { %4591 = shalt.err (!%p4588_p7)
}
  0x30   : > { %4393 = dma.hbm_to_vmem [thread:$0]  (!%p4792_p5), %s5451_s5, 1024, %s4798_s17, [#allocation5], %s4693_s19, %s4693_s19, %s4694_s20  }
  0x31   : > { %s4695_s13 = smov [#allocation9]  }
  0x32   : > { %s291_s14 = sshll.u32 %s4695_s13, 4  ;;  %s292_s14 = int_to_ptr.vmem [resolvable:$true] %s291_s14 }
  0x33   : > { %s4603_s16 = scalar_lea.vmem %s292_s14, 640  ;;  %p4611_p11 = scmp.lt.s32.totalorder %s292_s14, %s292_s14 }
  0x34   : > { %p4604_p8 = scmp.ne.s32.totalorder %s292_s14, %s4603_s16  ;;  %p4612_p12 = scmp.lt.s32.totalorder %s4603_s16, %s4603_s16 }
  0x36   : > { %p4606_p9 = pnand %p4604_p8, %p4516_p6  ;;  %p4613_p13 = por %p4612_p12, %p4611_p11 }
  0x38   : > { %p4607_p10 = pneg %p4606_p9 }
  0x3a   : > { %p4614_p0 = pnand %p4613_p13, %p4607_p10 }
  0x3c   : > { %4617 = shalt.err (!%p4614_p0)
}
  0x3d   : > { %4399 = dma.hbm_to_vmem [thread:$0]  (!%p4792_p5), %s5453_s7, 640, %s292_s14, [#allocation8], %s4693_s19, %s4693_s19, %s4694_s20  }
  0x3e   : > { %s4857_s15 = sadd.s32 1, %s4688_s30   ;;  %s82_s21 = sadd.s32 1, %s4684_s29 }
  0x3f   : > { %s79_s22 = ssub.s32 %s4688_s30, %s4857_s15  ;;  %p89_p6 = scmp.ne.s32.totalorder %s4684_s29, %s4680_s28 }
  0x40   : > { %p80_p2 = scmp.eq.s32.totalorder %s79_s22, 0  ;;  %p90_p4 = scmp.eq.s32.totalorder %s4688_s30, 0 }
  0x41   : > { %p95_p7 = scmp.ne.s32.totalorder %s4680_s28, %s4676_s27  ;;  %p4408_p8 = scmp.lt.s32.totalorder %s4688_s30, 2 }
  0x42   : > { %s4869_s23 = scalar_select %p80_p2, %s4684_s29, %s82_s21  }
  0x43   : > { %p91_p9 = por %p90_p4, %p89_p6  ;;  %p4873_p10 = por %p5455_p1, %p95_p7 }
  0x44   : > { %s319_s25 = sand.u32 1, %s4684_s29   ;;  %s3932_s19 = sshll.u32 %s4688_s30, 4 }
  0x45   : > { %s5461_s24 = scalar_select %p4873_p10, 1, 0 }
  0x46   : > { %s4882_s9 = scalar_lea.hbm %s5448_s2, %s3932_s19  ;;  %s322_s27 = scalar_lea.vmem [#allocation2], %s319_s25 }
  0x47   : > { %s329_s10 = sshll.u32 %s322_s27, 4  ;;  %p4884_p5 = pnand %p4408_p8, %p91_p9  ;;  %s330_s10 = int_to_ptr.vmem [resolvable:$true] %s329_s10 }
  0x48   : > { %s320_s14 = scalar_lea.sflag [#allocation3], %s319_s25  ;;  %s4618_s16 = scalar_lea.hbm %s4882_s9, 16 }
  0x49   : > { %p4619_p11 = scmp.ne.s32.totalorder %s4882_s9, %s4618_s16  ;;  %p4620_p12 = pneg %p4884_p5 }
  0x4a   : > { %s4623_s18 = scalar_lea.hbm %s5448_s2, 32  ;;  %p4624_p6 = scmp.lt.s32.totalorder %s4882_s9, %s5448_s2 }
  0x4b   : > { %p4621_p13 = pnand %p4620_p12, %p4619_p11  ;;  %p4625_p2 = scmp.lt.s32.totalorder %s4623_s18, %s4618_s16 }
  0x4d   : > { %p4622_p0 = pneg %p4621_p13  ;;  %p4626_p4 = por %p4625_p2, %p4624_p6 }
  0x4f   : > { %p4627_p7 = pnand %p4626_p4, %p4622_p0 }
  0x51   : > { %4630 = shalt.err (!%p4627_p7)
}
  0x52   : > { %s4631_s19 = scalar_lea.vmem %s330_s10, 16  ;;  %s4696_s25 = smov [#allocation2]  }
  0x53   : > { %p4632_p8 = scmp.ne.s32.totalorder %s330_s10, %s4631_s19  ;;  %s4636_s20 = sshll.u32 %s4696_s25, 4  ;;  %s4637_s20 = int_to_ptr.vmem [resolvable:$false] %s4636_s20 }
  0x54   : > { %s4638_s26 = scalar_lea.vmem %s4637_s20, 32  ;;  %p4639_p11 = scmp.lt.s32.totalorder %s330_s10, %s4637_s20 }
  0x55   : > { %p4634_p9 = pnand %p4632_p8, %p4620_p12  ;;  %p4640_p13 = scmp.lt.s32.totalorder %s4638_s26, %s4631_s19 }
  0x57   : > { %p4635_p1 = pneg %p4634_p9  ;;  %p4641_p10 = por %p4640_p13, %p4639_p11 }
  0x59   : > { %p4642_p3 = pnand %p4641_p10, %p4635_p1 }
  0x5b   : > { %4645 = shalt.err (!%p4642_p3)
}
  0x5c   : > { %4403 = dma.hbm_to_vmem [thread:$0]  (!%p4884_p5), %s4882_s9, 16, %s330_s10, %s320_s14  }
  0x5d   : > { %p5463_p0 = scmp.ne.s32.totalorder %s5459_s12, 0 }
  0x5e   : > { %s340_s27 = sand.u32 (!%p5463_p0), 1, %s4680_s28   ;;  %p5464_p12 = scmp.ne.s32.totalorder (!%p5463_p0), %s5461_s24, 0 }
  0x5f   : > { %338 = sbr.rel (%p5463_p0) target bundleno = 8312 (0x2078), region = 52  ;;  %s341_s16 = scalar_lea.sflag (!%p5463_p0), [#allocation3], %s340_s27 }
  0x60   : > { %s4905_s30 = scalar_lea.vmem (!%p5463_p0), [#allocation2], %s340_s27 }
  0x64   : > { %4663 = dma.done.wait (%p5464_p12), %s341_s16, 16  }
  0x65   : > { %4665 = vsyncadd (%p5464_p12), %s341_s16, 4294967280  ;;  %p5465_p1 = scmp.eq.s32.totalorder %s4779_s11, 0 }
  0x67   : > { %4667 = dma.done.wait (%p5465_p1), [#allocation5], 1536   ;;  %p5466_p3 = pmov %p5465_p1 }
  0x68   : > { %p5467_p10 = pmov %p5465_p1 }
  0x69   : > { %4669 = vsyncadd (%p5466_p3), [#allocation5], 4294965760 }
  0x6a   : > { %4671 = dma.done.wait (%p5467_p10), [#allocation8], 896   ;;  %p5468_p5 = pmov %p5465_p1 }
  0x6b   : > { %p397_p6 = scmp.lt.s32.totalorder %s4779_s11, 1  ;;  %v4697_v0 = vmov 127   ;;  %v4698_v1 = vmov 0.0   ;;  %vm4699_vm0 = vmmov 0   ;;  %v4938_v3 = vld [vmem:[#allocation4] sm:$0xff]  ;;  %s4700_s18 = smov 32   ;;  %v416_v6 = vlaneseq }
  0x6c   : > { %4673 = vsyncadd (%p5468_p5), [#allocation8], 4294966400  ;;  %4467 = vset.pattern.permute.xlu0 %v4697_v0  ;;  %4469 = vset.pattern.permute.xlu1 %v4697_v0  ;;  %v4701_v5 = vmov 0   ;;  %vm534_vm1 = vcmask 64512   ;;  %v4998_v40 = vld [vmem:[#allocation4 + $0x18] sm:$0xff]  ;;  %v5002_v41 = vld [vmem:[#allocation4 + $0x10] sm:$0xff] }
  0x6d   : > { %s5475_s11 = smov (!%p397_p6, %s4779_s11), 1  ;;  %4124 = vmatprep.subr.mxu1 %v4698_v1  ;;  %4119 = vmatprep.subr.mxu0 %v4698_v1  ;;  %v4944_v8 = vshrl.u32 %v416_v6, 7  ;;  %v507_v9 = vand.u32 127, %v416_v6  ;;  %v5005_v42 = vld [vmem:[#allocation4 + $0x8] sm:$0xff]  ;;  %s4702_s21 = smov 96   ;;  %vm878_vm14 = vcmask 261120  }
  0x6e   : > { %s3938_s12 = sshll.u32 %s5475_s11, 3  ;;  %4126 = vmatprep.mubr.msk.f32.mxu1 %vm4699_vm0, %v4698_v1  ;;  %4121 = vmatprep.mubr.msk.f32.mxu0 %vm4699_vm0, %v4698_v1  ;;  %s4703_s22 = smov 64   ;;  %vm2312_vm15 = vcmask 523264  }
  0x6f   : > { %s400_s10 = scalar_lea.vmem %s5446_s0, %s3938_s12  ;;  %s404_s17 = scalar_lea.vmem %s5447_s1, %s3938_s12  ;;  %527 = vrot.lane.b32.xlu1 %v4938_v3, %s4700_s18  ;;  %v418_v10 = vsub.s32 5, %v4944_v8  ;;  %v692_v28 = vadd.s32 1, %v507_v9  ;;  %v696_v30 = vadd.s32 1, %v4944_v8  ;;  %v5013_v43 = vsub.s32 0, %v4944_v8 }
  0x70   : > { %v4936_v2 = vld [vmem:[%s400_s10] sm:$0xff]  ;;  %v5016_v45 = vsub.s32 1, %v4944_v8  ;;  %v5024_v52 = vsub.s32 2, %v4944_v8  ;;  %v461_v56 = vsub.s32 3, %v4944_v8  ;;  %v472_v61 = vsub.s32 4, %v4944_v8  ;;  %s4705_s9 = smov 120  }
  0x71   : > { %515 = vperm.xlu0 %4467, %v4936_v2   ;;  %v409_v4 = vld [vmem:[%s404_s17] sm:$0xff]  ;;  %v4950_v12 = vrot.slane %v4938_v3, %v418_v10  ;;  %vm432_vm4 = vcmp.eq.s32.totalorder %v4936_v2, 1  ;;  %vm421_vm5 = vcmp.eq.s32.totalorder %v4936_v2, 0  ;;  %vm443_vm6 = vcmp.eq.s32.totalorder %v4936_v2, 2  ;;  %s4706_s10 = smov 80   ;;  %s4707_s13 = smov 56  }
  0x72   : > { %vm454_vm7 = vcmp.eq.s32.totalorder %v4936_v2, 3  ;;  %v3941_v20 = vsel %vm432_vm4, 1.0, %v4698_v1  ;;  %v3940_v21 = vsel %vm421_vm5, 1.0, %v4698_v1  ;;  %v3942_v22 = vsel %vm443_vm6, 1.0, %v4698_v1  ;;  %s4708_s14 = smov 112   ;;  %s4709_s17 = smov 48  }
  0x73   : > { %609 = vperm.xlu1 %4469, %v409_v4   ;;  %v3943_v23 = vsel %vm454_vm7, 1.0, %v4698_v1  ;;  %vm465_vm8 = vcmp.eq.s32.totalorder %v4936_v2, 4  ;;  %vm476_vm9 = vcmp.eq.s32.totalorder %v4936_v2, 5  ;;  %vm483_vm10 = vcmp.eq.s32.totalorder %v4936_v2, 6  ;;  %s4710_s19 = smov 72   ;;  %s4711_s25 = smov 104  }
  0x74   : > { %v3944_v24 = vsel %vm465_vm8, 1.0, %v4698_v1  ;;  %v3945_v25 = vsel %vm476_vm9, 1.0, %v4698_v1  ;;  %vm494_vm11 = vcmp.eq.s32.totalorder %v4936_v2, 7  ;;  %v3946_v26 = vsel %vm483_vm10, 1.0, %v4698_v1  ;;  %s5458_s20 = smov 40  }
  0x75   : > { %4468 = vset.pattern.permute.xlu0 %v4701_v5  ;;  %v3947_v27 = vsel %vm494_vm11, 1.0, %v4698_v1  ;;  %vm693_vm12 = vcmp.eq.s32.totalorder %v692_v28, %v4944_v8  ;;  %vm697_vm13 = vcmp.eq.s32.totalorder %v507_v9, %v696_v30  ;;  %v429_v46 = vrot.slane %v4938_v3, %v5013_v43 }
  0x76   : > { %509 = vperm.xlu0 %4468, %v4936_v2   ;;  %v3952_v33 = vsel %vm693_vm12, 1.0, %v4698_v1  ;;  %v3953_v38 = vsel %vm697_vm13, 1.0, %v4698_v1  ;;  %v440_v50 = vrot.slane %v4938_v3, %v5016_v45  ;;  %v451_v55 = vrot.slane %v4938_v3, %v5024_v52 }
  0x77   : > { %4470 = vset.pattern.permute.xlu1 %v4701_v5  ;;  %v462_v60 = vrot.slane %v4938_v3, %v461_v56  ;;  %v473_v2 = vrot.slane %v4938_v3, %v472_v61  ;;  %v1117_v30 = vrot.slane %v5005_v42, %v5013_v43 }
  0x78   : > { %522 = vperm.xlu1 %4470, %v409_v4  }
  0x7a   : > { %4471 = vset.pattern.permute.xlu0 %v4697_v0 }
  0xe1   : > { %v528_v7 = vpop.permute.xlu1 %527 }
  0xe2   : > { %4125 = vmatpush3.msra.mxu1 %v528_v7  ;;  %4120 = vmatpush3.msra.mxu0 %v528_v7  ;;  %v490_v7 = vsub.s32 6, %v4944_v8 }
  0xe3   : > { %4129 = vmatprep.subr.mxu0 %v4698_v1  ;;  %4134 = vmatprep.subr.mxu1 %v4698_v1 }
  0xec   : > { %v516_v11 = vpop.permute.xlu0 %515 }
  0xed   : > { %vm517_vm2 = vcmp.eq.s32.totalorder %v516_v11, %v507_v9 }
  0xee   : > { %v3949_v13 = vsel %vm517_vm2, 1.0, %v4698_v1  ;;  %v610_v14 = vpop.permute.xlu1 %609 }
  0xef   : > { %4127 = vmatmul.mubr.msk.f32.vlgmr.msra.gmra.mxu1 %vm534_vm1, %v3949_v13  ;;  %v612_v16 = vmul.f32 %v610_v14, %v4950_v12 }
  0xf0   : > { %4136 = vmatprep.mubr.msk.f32.mxu1 %vm4699_vm0, %v4698_v1 }
  0xf1   : > { %v510_v15 = vpop.permute.xlu0 %509  ;;  %614 = vrot.lane.b32.xlu0 %v612_v16, %s4700_s18  ;;  %v491_v16 = vrot.slane %v4938_v3, %v490_v7 }
  0xf2   : > { %vm511_vm3 = vcmp.eq.s32.totalorder %v510_v15, %v507_v9 }
  0xf3   : > { %v3948_v17 = vsel %vm511_vm3, 1.0, %v4698_v1  ;;  %v523_v18 = vpop.permute.xlu1 %522 }
  0xf4   : > { %4122 = vmatmul.mubr.msk.f32.vlgmr.msra.gmra.mxu0 %vm534_vm1, %v3948_v17  ;;  %v525_v19 = vmul.f32 %v523_v18, %v4950_v12  ;;  %v501_v17 = vsub.s32 7, %v4944_v8 }
  0xf5   : > { %4131 = vmatprep.mubr.msk.f32.mxu0 %vm4699_vm0, %v4698_v1 }
  0xf6   : > { %531 = vrot.lane.b32.xlu1 %v525_v19, %s4700_s18 }
 0x110   : > { %414 = vadd.xlane.f32.xlu0 %v409_v4 }
 0x114   : > { %435 = vadd.xlane.f32.xlu0 %v3941_v20 }
 0x118   : > { %446 = vadd.xlane.f32.xlu0 %v3942_v22 }
 0x11a   : > { %424 = vadd.xlane.f32.xlu1 %v3940_v21 }
 0x11c   : > { %468 = vadd.xlane.f32.xlu0 %v3944_v24  ;;  %v502_v24 = vrot.slane %v4938_v3, %v501_v17 }
 0x11e   : > { %457 = vadd.xlane.f32.xlu1 %v3943_v23 }
 0x120   : > { %486 = vadd.xlane.f32.xlu0 %v3946_v26 }
 0x122   : > { %479 = vadd.xlane.f32.xlu1 %v3945_v25 }
 0x126   : > { %497 = vadd.xlane.f32.xlu1 %v3947_v27 }
 0x163   : > { %v615_v29 = vpop.permute.xlu0 %614 }
 0x168   : > { %v532_v35 = vpop.permute.xlu1 %531 }
 0x199   : > { %v415_v44 = vpop.xlane.xlu0 %414 }
 0x19a   : > { %v420_v49 = vmul.f32 %v4950_v12, %v415_v44 }
 0x19d   : > { %v436_v48 = vpop.xlane.xlu0 %435 }
 0x19e   : > { %v441_v53 = vmul.f32 %v440_v50, %v436_v48  ;;  %v5090_v48 = vld [vmem:[%s5450_s4 + $0x10] sm:$0xff]  ;;  %v5101_v50 = vld [vmem:[%s5450_s4] sm:$0xff] }
 0x1a1   : > { %v447_v57 = vpop.xlane.xlu0 %446 }
 0x1a2   : > { %v452_v59 = vmul.f32 %v451_v55, %v447_v57 }
 0x1a3   : > { %v425_v47 = vpop.xlane.xlu1 %424 }
 0x1a4   : > { %v430_v51 = vmul.f32 %v429_v46, %v425_v47  ;;  %v5083_v47 = vld [vmem:[%s5450_s4 + $0x18] sm:$0xff] }
 0x1a5   : > { %v469_v4 = vpop.xlane.xlu0 %468 }
 0x1a6   : > { %v431_v54 = vadd.f32 %v430_v51, %v420_v49  ;;  %v474_v6 = vmul.f32 %v473_v2, %v469_v4  ;;  %v1132_v49 = vld [vmem:[%s5450_s4 + $0x8] sm:$0xff] }
 0x1a7   : > { %v458_v62 = vpop.xlane.xlu1 %457 }
 0x1a8   : > { %v442_v58 = vadd.f32 %v441_v53, %v431_v54  ;;  %v463_v0 = vmul.f32 %v462_v60, %v458_v62  ;;  %v3959_v60 = vld [vmem:[%s4905_s30] ss:$0 sm:$0xff]  ;;  %s4704_s30 = smov 88  }
 0x1a9   : > { %v487_v19 = vpop.xlane.xlu0 %486 }
 0x1aa   : > { %v453_v63 = vadd.f32 %v452_v59, %v442_v58  ;;  %v492_v23 = vmul.f32 %v491_v16, %v487_v19 }
 0x1ab   : > { %v480_v9 = vpop.xlane.xlu1 %479 }
 0x1ac   : > { %v464_v5 = vadd.f32 %v463_v0, %v453_v63  ;;  %v481_v15 = vmul.f32 %v480_v9, %v4950_v12  ;;  %v5112_v0 = vld [vmem:[#allocation7] sm:$0xff] }
 0x1ad   : > { %v5116_v2 = vrot.slane %v5112_v0, %v5013_v43 }
 0x1ae   : > { %v475_v14 = vadd.f32 %v474_v6, %v464_v5 }
 0x1af   : > { %v686_v31 = vpop.f32.mrf.mxu1  ;;  %v498_v26 = vpop.xlane.xlu1 %497 }
 0x1b0   : > { %v4982_v32 = vadd.f32 %v686_v31, %v615_v29  ;;  %v482_v22 = vadd.f32 %v481_v15, %v475_v14  ;;  %v503_v12 = vmul.f32 %v502_v24, %v498_v26 }
 0x1b1   : > { %v4128_v34 = vpop.f32.mrf.mxu1 }
 0x1b2   : > { %4130 = vmatpush3.msra.mxu0 %v4982_v32  ;;  %v493_v8 = vadd.f32 %v492_v23, %v482_v22 }
 0x1b3   : > { %4132 = vmatmul.mubr.msk.f32.vlgmr.msra.gmra.mxu0 %vm534_vm1, %v3952_v33  ;;  %4139 = vmatprep.subr.mxu0 %v4698_v1 }
 0x1b4   : > { %v604_v36 = vpop.f32.mrf.mxu0  ;;  %4147 = vmatprep.mubr.msk.f32.mxu0 %vm4699_vm0, %v4698_v1  ;;  %v504_v28 = vadd.f32 %v503_v12, %v493_v8 }
 0x1b5   : > { %v4990_v37 = vadd.f32 %v604_v36, %v532_v35 }
 0x1b6   : > { %v4123_v39 = vpop.f32.mrf.mxu0  ;;  %v505_v29 = vmul.f32 0.0078125, %v504_v28 }
 0x1b7   : > { %4135 = vmatpush3.msra.mxu1 %v4990_v37 }
 0x1b8   : > { %4137 = vmatmul.mubr.msk.f32.vlgmr.msra.gmra.mxu1 %vm534_vm1, %v3953_v38  ;;  %4150 = vmatprep.subr.mxu1 %v4698_v1 }
 0x1b9   : > { %4158 = vmatprep.mubr.msk.f32.mxu1 %vm4699_vm0, %v4698_v1  ;;  %4151 = vmatpush3.msra.mxu1 %v4998_v40 }
 0x1ba   : > { %4152 = vmatprep.subr.mxu1 %v4698_v1 }
 0x1bb   : > { %4153 = vmatpush3.msra.mxu1 %v5002_v41 }
 0x1bc   : > { %4154 = vmatprep.subr.mxu1 %v4698_v1 }
 0x1bd   : > { %4155 = vmatpush3.msra.mxu1 %v5005_v42 }
 0x1be   : > { %4156 = vmatprep.subr.mxu1 %v4698_v1 }
 0x1bf   : > { %4157 = vmatpush3.msra.mxu1 %v4938_v3 }
 0x1c0   : > { %4172 = vmatprep.subr.mxu1 %v4698_v1 }
 0x273   : > { %v769_v10 = vpop.f32.mrf.mxu0 }
 0x274   : > { %v846_v11 = vsub.f32 %v769_v10, %v4982_v32 }
 0x275   : > { %v4133_v13 = vpop.f32.mrf.mxu0 }
 0x276   : > { %v847_v18 = vmul.f32 0.0078125, %v846_v11 }
 0x278   : > { %v842_v20 = vpop.f32.mrf.mxu1  ;;  %849 = vrot.lane.b32.xlu0 %v847_v18, %s4702_s21 }
 0x279   : > { %v853_v21 = vsub.f32 %v842_v20, %v4990_v37 }
 0x27a   : > { %v4138_v25 = vpop.f32.mrf.mxu1 }
 0x27b   : > { %v854_v27 = vmul.f32 0.0078125, %v853_v21 }
 0x27c   : > { %870 = vrot.lane.b32.xlu0 %v5002_v41, %s4702_s21 }
 0x27d   : > { %856 = vrot.lane.b32.xlu1 %v854_v27, %s4702_s21 }
 0x280   : > { %866 = vrot.lane.b32.xlu0 %v4938_v3, %s4702_s21 }
 0x281   : > { %872 = vrot.lane.b32.xlu1 %v4998_v40, %s4702_s21 }
 0x284   : > { %1035 = vrot.lane.b32.xlu0 %v4998_v40, %s4703_s22 }
 0x285   : > { %868 = vrot.lane.b32.xlu1 %v5005_v42, %s4702_s21 }
 0x288   : > { %1031 = vrot.lane.b32.xlu0 %v5005_v42, %s4703_s22 }
 0x289   : > { %861 = vrot.lane.b32.xlu1 %v505_v29, %s4700_s18 }
 0x28c   : > { %1029 = vrot.lane.b32.xlu0 %v4938_v3, %s4703_s22 }
 0x28d   : > { %1033 = vrot.lane.b32.xlu1 %v5002_v41, %s4703_s22 }
 0x290   : > { %1119 = vrot.lane.b32.xlu0 %v1117_v30, %s4700_s18 }
 0x2ea   : > { %v850_v31 = vpop.permute.xlu0 %849 }
 0x2eb   : > { %v852_v32 = vadd.f32 %v850_v31, %v505_v29 }
 0x2ed   : > { %952 = vrot.lane.b32.xlu1 %v852_v32, %s4700_s18 }
 0x2ee   : > { %v871_v33 = vpop.permute.xlu0 %870 }
 0x2ef   : > { %v857_v34 = vpop.permute.xlu1 %856 }
 0x2f0   : > { %v859_v35 = vadd.f32 %v857_v34, %v505_v29 }
 0x2f2   : > { %1027 = vrot.lane.b32.xlu1 %v859_v35, %s4700_s18  ;;  %v867_v36 = vpop.permute.xlu0 %866 }
 0x2f3   : > { %v873_v37 = vpop.permute.xlu1 %872 }
 0x2f4   : > { %4140 = vmatpush3.msra.mxu0 %v873_v37 }
 0x2f5   : > { %4141 = vmatprep.subr.mxu0 %v4698_v1 }
 0x2f6   : > { %4142 = vmatpush3.msra.mxu0 %v871_v33  ;;  %v1036_v3 = vpop.permute.xlu0 %1035 }
 0x2f7   : > { %v869_v38 = vpop.permute.xlu1 %868  ;;  %4143 = vmatprep.subr.mxu0 %v4698_v1 }
 0x2f8   : > { %4144 = vmatpush3.msra.mxu0 %v869_v38 }
 0x2f9   : > { %4145 = vmatprep.subr.mxu0 %v4698_v1 }
 0x2fa   : > { %4146 = vmatpush3.msra.mxu0 %v867_v36  ;;  %v1032_v40 = vpop.permute.xlu0 %1031 }
 0x2fb   : > { %v862_v39 = vpop.permute.xlu1 %861  ;;  %4161 = vmatprep.subr.mxu0 %v4698_v1 }
 0x2fc   : > { %4148 = vmatmul.mubr.msk.f32.vlgmr.msra.gmra.mxu0 %vm878_vm14, %v862_v39 }
 0x2fd   : > { %4162 = vmatpush3.msra.mxu0 %v1036_v3  ;;  %4169 = vmatprep.mubr.msk.f32.mxu0 %vm4699_vm0, %v4698_v1 }
 0x2fe   : > { %4163 = vmatprep.subr.mxu0 %v4698_v1  ;;  %v1030_v42 = vpop.permute.xlu0 %1029 }
 0x2ff   : > { %v1034_v41 = vpop.permute.xlu1 %1033 }
 0x300   : > { %4164 = vmatpush3.msra.mxu0 %v1034_v41 }
 0x301   : > { %4165 = vmatprep.subr.mxu0 %v4698_v1 }
 0x302   : > { %4166 = vmatpush3.msra.mxu0 %v1032_v40  ;;  %v1120_v58 = vpop.permute.xlu0 %1119 }
 0x303   : > { %4167 = vmatprep.subr.mxu0 %v4698_v1 }
 0x304   : > { %4168 = vmatpush3.msra.mxu0 %v1030_v42 }
 0x305   : > { %4183 = vmatprep.subr.mxu0 %v4698_v1 }
 0x35f   : > { %v953_v44 = vpop.permute.xlu1 %952 }
 0x360   : > { %4159 = vmatmul.mubr.msk.f32.vlgmr.msra.gmra.mxu1 %vm878_vm14, %v953_v44 }
 0x361   : > { %4180 = vmatprep.mubr.msk.f32.mxu1 %vm4699_vm0, %v4698_v1  ;;  %4173 = vmatpush3.msra.mxu1 %v5083_v47 }
 0x362   : > { %4174 = vmatprep.subr.mxu1 %v4698_v1 }
 0x363   : > { %4175 = vmatpush3.msra.mxu1 %v5090_v48 }
 0x364   : > { %v1028_v46 = vpop.permute.xlu1 %1027  ;;  %4176 = vmatprep.subr.mxu1 %v4698_v1 }
 0x365   : > { %4170 = vmatmul.mubr.msk.f32.vlgmr.msra.gmra.mxu0 %vm878_vm14, %v1028_v46  ;;  %4177 = vmatpush3.msra.mxu1 %v1132_v49 }
 0x366   : > { %4185 = vmatprep.mubr.msk.f32.mxu0 %vm4699_vm0, %v4698_v1  ;;  %4178 = vmatprep.subr.mxu1 %v4698_v1 }
 0x367   : > { %4179 = vmatpush3.msra.mxu1 %v5101_v50 }
 0x368   : > { %4188 = vmatprep.subr.mxu1 %v4698_v1 }
 0x3bc   : > { %v947_v51 = vpop.f32.mrf.mxu0 }
 0x3be   : > { %v4149_v53 = vpop.f32.mrf.mxu0 }
 0x420   : > { %v1022_v54 = vpop.f32.mrf.mxu1 }
 0x421   : > { %v1023_v56 = vadd.f32 %v1022_v54, %v947_v51 }
 0x422   : > { %v4160_v55 = vpop.f32.mrf.mxu1 }
 0x425   : > { %v1109_v57 = vpop.f32.mrf.mxu0 }
 0x426   : > { %v1113_v59 = vadd.f32 %v1109_v57, %v1023_v56 }
 0x427   : > { %v4171_v61 = vpop.f32.mrf.mxu0 }
 0x428   : > { %v1122_v62 = vadd.f32 %v1120_v58, %v1113_v59 }
 0x42a   : > { %v5106_v63 = vadd.f32 %v3959_v60, %v1122_v62 }
 0x42c   : > { %4181 = vmatmul.mubr.msk.f32.vlgmr.msra.gmra.mxu1 %vm878_vm14, %v5106_v63 }
 0x42d   : > { %4190 = vmatprep.mubr.msk.f32.mxu1 %vm4699_vm0, %v4698_v1 }
 0x4ec   : > { %v1213_v4 = vpop.f32.mrf.mxu1 }
 0x4ed   : > { %v5119_v5 = vadd.f32 %v1213_v4, %v5116_v2 }
 0x4ee   : > { %v4182_v6 = vpop.f32.mrf.mxu1 }
 0x4ef   : > { %1385 = vrot.lane.b32.xlu0 %v5119_v5, %s4704_s30  ;;  %1219 = vrot.lane.b32.xlu1 %v5119_v5, %s4702_s21  ;;  %v5126_v7 = vmul.f32 0.35355338, %v5119_v5 }
 0x4f3   : > { %1383 = vrot.lane.b32.xlu1 %v5126_v7, %s4705_s9 }
 0x561   : > { %v1220_v9 = vpop.permute.xlu1 %1219  ;;  %v1386_v10 = vpop.permute.xlu0 %1385 }
 0x562   : > { %4184 = vmatpush3.xpose.msk.msra.mxu0 %vm534_vm1, %v1220_v9 }
 0x563   : > { %4193 = vmatprep.subr.mxu0 %v4698_v1 }
 0x565   : > { %4186 = vmatmul.mubr.msk.f32.vlgmr.msra.gmra.mxu0 %vm534_vm1, %v5126_v7  ;;  %v1384_v11 = vpop.permute.xlu1 %1383 }
 0x566   : > { %4194 = vmatpush3.xpose.msk.msra.mxu0 %vm534_vm1, %v1386_v10  ;;  %4195 = vmatprep.mubr.msk.f32.mxu0 %vm4699_vm0, %v4698_v1 }
 0x567   : > { %4203 = vmatprep.subr.mxu0 %v4698_v1 }
 0x569   : > { %4196 = vmatmul.mubr.msk.f32.vlgmr.msra.gmra.mxu0 %vm534_vm1, %v1384_v11 }
 0x56a   : > { %4205 = vmatprep.mubr.msk.f32.mxu0 %vm4699_vm0, %v4698_v1 }
 0x625   : > { %v1292_v13 = vpop.f32.mrf.mxu0 }
 0x626   : > { %v1296_v14 = vsel %vm534_vm1, %v1292_v13, -inf }
 0x627   : > { %1297 = vmax.xlane.f32.xlu0 %v1296_v14  ;;  %v4187_v15 = vpop.f32.mrf.mxu0 }
 0x629   : > { %v1457_v16 = vpop.f32.mrf.mxu0 }
 0x62a   : > { %v1461_v17 = vsel %vm534_vm1, %v1457_v16, -inf }
 0x62b   : > { %1462 = vmax.xlane.f32.xlu1 %v1461_v17  ;;  %v4197_v18 = vpop.f32.mrf.mxu0 }
 0x63c   : > { %1307 = vrot.lane.b32.xlu1 %v5119_v5, %s4703_s22 }
 0x640   : > { %1549 = vrot.lane.b32.xlu1 %v1132_v49, %s4700_s18 }
 0x644   : > { %1704 = vrot.lane.b32.xlu1 %v5119_v5, %s4706_s10 }
 0x6b0   : > { %v1298_v19 = vpop.xlane.xlu0 %1297 }
 0x6b1   : > { %v1299_v20 = vsub.f32 %v1292_v13, %v1298_v19 }
 0x6b3   : > { %v1300_v21 = vmul.f32 1.442695, %v1299_v20 }
 0x6b4   : > { %v1463_v22 = vpop.xlane.xlu1 %1462 }
 0x6b5   : > { %4472 = vpow2.f32 %v1300_v21  ;;  %v1464_v23 = vsub.f32 %v1457_v16, %v1463_v22 }
 0x6b7   : > { %v1465_v24 = vmul.f32 1.442695, %v1464_v23 }
 0x6b8   : > { %v1308_v25 = vpop.permute.xlu1 %1307 }
 0x6b9   : > { %4474 = vpow2.f32 %v1465_v24  ;;  %4189 = vmatpush3.msra.mxu1 %v1308_v25 }
 0x6ba   : > { %4198 = vmatprep.subr.mxu1 %v4698_v1 }
 0x6bc   : > { %v1550_v26 = vpop.permute.xlu1 %1549 }
 0x6bd   : > { %4204 = vmatpush3.msra.mxu0 %v1550_v26 }
 0x6be   : > { %4213 = vmatprep.subr.mxu0 %v4698_v1 }
 0x6c0   : > { %v1705_v38 = vpop.permute.xlu1 %1704 }
 0x6c2   : > { %v4473_v27 = vpop.eup %4472 }
 0x6c3   : > { %v1302_v8 = vsel %vm534_vm1, %v4473_v27, 0.0 }
 0x6c4   : > { %1303 = vadd.xlane.f32.xlu0 %v1302_v8 }
 0x6c6   : > { %v4475_v12 = vpop.eup %4474 }
 0x6c7   : > { %v1467_v28 = vsel %vm534_vm1, %v4475_v12, 0.0 }
 0x6c8   : > { %1468 = vadd.xlane.f32.xlu0 %v1467_v28 }
 0x6de   : > { %1472 = vrot.lane.b32.xlu0 %v5119_v5, %s4707_s13 }
 0x6e2   : > { %1702 = vrot.lane.b32.xlu0 %v5126_v7, %s4708_s14 }
 0x74d   : > { %v1304_v29 = vpop.xlane.xlu0 %1303 }
 0x74e   : > { %4476 = vrcp.f32 %v1304_v29 }
 0x751   : > { %v1469_v30 = vpop.xlane.xlu0 %1468 }
 0x752   : > { %4478 = vrcp.f32 %v1469_v30 }
 0x755   : > { %v1473_v33 = vpop.permute.xlu0 %1472 }
 0x759   : > { %v1703_v40 = vpop.permute.xlu0 %1702 }
 0x75b   : > { %v4477_v31 = vpop.eup %4476 }
 0x75c   : > { %v1306_v32 = vmul.f32 %v4477_v31, %v4473_v27 }
 0x75e   : > { %4191 = vmatmul.mubr.msk.f32.vlgmr.msra.gmra.mxu1 %vm534_vm1, %v1306_v32 }
 0x75f   : > { %v4479_v34 = vpop.eup %4478  ;;  %4199 = vmatpush3.msra.mxu1 %v1473_v33  ;;  %4200 = vmatprep.mubr.msk.f32.mxu1 %vm4699_vm0, %v4698_v1 }
 0x760   : > { %v1471_v35 = vmul.f32 %v4479_v34, %v4475_v12  ;;  %4208 = vmatprep.subr.mxu1 %v4698_v1 }
 0x762   : > { %4201 = vmatmul.mubr.msk.f32.vlgmr.msra.gmra.mxu1 %vm534_vm1, %v1471_v35 }
 0x763   : > { %4210 = vmatprep.mubr.msk.f32.mxu1 %vm4699_vm0, %v4698_v1 }
 0x81e   : > { %v1379_v36 = vpop.f32.mrf.mxu1 }
 0x820   : > { %v4192_v37 = vpop.f32.mrf.mxu1 }
 0x821   : > { %v1138_v37 = vld [vmem:[#allocation6 + $0x18] sm:$0xff] }
 0x822   : > { %v1544_v3 = vpop.f32.mrf.mxu1 }
 0x823   : > { %4206 = vmatmul.mubr.msk.f32.vlgmr.msra.gmra.mxu0 %vm534_vm1, %v1544_v3  ;;  %v1137_v3 = vld [vmem:[#allocation6 + $0x10] sm:$0xff] }
 0x824   : > { %4214 = vmatpush3.xpose.msk.msra.mxu0 %vm534_vm1, %v1705_v38  ;;  %v4202_v39 = vpop.f32.mrf.mxu1  ;;  %4215 = vmatprep.mubr.msk.f32.mxu0 %vm4699_vm0, %v4698_v1  ;;  %v1136_v38 = vld [vmem:[#allocation6 + $0x8] sm:$0xff] }
 0x825   : > { %4223 = vmatprep.subr.mxu0 %v4698_v1  ;;  %v1135_v39 = vld [vmem:[#allocation6] sm:$0xff] }
 0x827   : > { %4216 = vmatmul.mubr.msk.f32.vlgmr.msra.gmra.mxu0 %vm534_vm1, %v1703_v40  ;;  %v2221_v40 = vrot.slane %v5112_v0, %v5016_v45 }
 0x828   : > { %4225 = vmatprep.mubr.msk.f32.mxu0 %vm4699_vm0, %v4698_v1 }
 0x8e3   : > { %v5171_v41 = vpop.f32.mrf.mxu0 }
 0x8e5   : > { %v4207_v42 = vpop.f32.mrf.mxu0 }
 0x8e7   : > { %v1776_v44 = vpop.f32.mrf.mxu0 }
 0x8e8   : > { %v1780_v46 = vsel %vm534_vm1, %v1776_v44, -inf }
 0x8e9   : > { %1781 = vmax.xlane.f32.xlu1 %v1780_v46  ;;  %v4217_v49 = vpop.f32.mrf.mxu0 }
 0x8fa   : > { %1791 = vrot.lane.b32.xlu1 %v5119_v5, %s4709_s17 }
 0x8fe   : > { %1947 = vrot.lane.b32.xlu1 %v5119_v5, %s4710_s19 }
 0x972   : > { %v1782_v51 = vpop.xlane.xlu1 %1781 }
 0x973   : > { %v1783_v53 = vsub.f32 %v1776_v44, %v1782_v51 }
 0x975   : > { %v1784_v54 = vmul.f32 1.442695, %v1783_v53 }
 0x976   : > { %v1792_v59 = vpop.permute.xlu1 %1791 }
 0x977   : > { %4480 = vpow2.f32 %v1784_v54 }
 0x97a   : > { %v1948_v61 = vpop.permute.xlu1 %1947 }
 0x984   : > { %v4481_v55 = vpop.eup %4480 }
 0x985   : > { %v1786_v56 = vsel %vm534_vm1, %v4481_v55, 0.0 }
 0x986   : > { %1787 = vadd.xlane.f32.xlu0 %v1786_v56 }
 0x99c   : > { %1626 = vrot.lane.b32.xlu0 %v5101_v50, %s4700_s18 }
 0x9a0   : > { %1945 = vrot.lane.b32.xlu0 %v5126_v7, %s4711_s25 }
 0xa0f   : > { %v1788_v57 = vpop.xlane.xlu0 %1787 }
 0xa10   : > { %4482 = vrcp.f32 %v1788_v57 }
 0xa13   : > { %v1627_v58 = vpop.permute.xlu0 %1626 }
 0xa14   : > { %4209 = vmatpush3.msra.mxu1 %v1627_v58 }
 0xa15   : > { %4211 = vmatmul.mubr.msk.f32.vlgmr.msra.gmra.mxu1 %vm534_vm1, %v1379_v36  ;;  %4218 = vmatprep.subr.mxu1 %v4698_v1 }
 0xa16   : > { %4219 = vmatpush3.msra.mxu1 %v1792_v59  ;;  %4220 = vmatprep.mubr.msk.f32.mxu1 %vm4699_vm0, %v4698_v1 }
 0xa17   : > { %4228 = vmatprep.subr.mxu1 %v4698_v1  ;;  %v1946_v62 = vpop.permute.xlu0 %1945 }
 0xa1d   : > { %v4483_v50 = vpop.eup %4482 }
 0xa1e   : > { %v1790_v60 = vmul.f32 %v4483_v50, %v4481_v55 }
 0xa20   : > { %4221 = vmatmul.mubr.msk.f32.vlgmr.msra.gmra.mxu1 %vm534_vm1, %v1790_v60 }
 0xa21   : > { %4229 = vmatpush3.xpose.msk.msra.mxu1 %vm534_vm1, %v1948_v61  ;;  %4230 = vmatprep.mubr.msk.f32.mxu1 %vm4699_vm0, %v4698_v1 }
 0xa22   : > { %4238 = vmatprep.subr.mxu1 %v4698_v1 }
 0xa24   : > { %4231 = vmatmul.mubr.msk.f32.vlgmr.msra.gmra.mxu1 %vm534_vm1, %v1946_v62 }
 0xa25   : > { %4240 = vmatprep.mubr.msk.f32.mxu1 %vm4699_vm0, %v4698_v1 }
 0xad5   : > { %v1698_v4 = vpop.f32.mrf.mxu1 }
 0xad6   : > { %v1699_v21 = vadd.f32 %v1698_v4, %v5171_v41 }
 0xad7   : > { %v4212_v6 = vpop.f32.mrf.mxu1 }
 0xae0   : > { %v1863_v7 = vpop.f32.mrf.mxu1 }
 0xae2   : > { %v4222_v9 = vpop.f32.mrf.mxu1 }
 0xae4   : > { %v2019_v10 = vpop.f32.mrf.mxu1 }
 0xae5   : > { %v2023_v11 = vsel %vm534_vm1, %v2019_v10, -inf }
 0xae6   : > { %2024 = vmax.xlane.f32.xlu1 %v2023_v11  ;;  %v4232_v13 = vpop.f32.mrf.mxu1 }
 0xaf7   : > { %2034 = vrot.lane.b32.xlu1 %v5119_v5, %s5458_s20 }
 0xafb   : > { %2111 = vrot.lane.b32.xlu1 %v5083_v47, %s4700_s18 }
 0xb6f   : > { %v2025_v14 = vpop.xlane.xlu1 %2024 }
 0xb70   : > { %v2026_v15 = vsub.f32 %v2019_v10, %v2025_v14 }
 0xb72   : > { %v2027_v16 = vmul.f32 1.442695, %v2026_v15 }
 0xb73   : > { %v2035_v20 = vpop.permute.xlu1 %2034 }
 0xb74   : > { %4484 = vpow2.f32 %v2027_v16  ;;  %v5256_v16 = vld [vmem:[%s5450_s4 + $0x38] sm:$0xff] }
 0xb81   : > { %v4485_v17 = vpop.eup %4484 }
 0xb82   : > { %v2029_v18 = vsel %vm534_vm1, %v4485_v17, 0.0 }
 0xb83   : > { %2030 = vadd.xlane.f32.xlu0 %v2029_v18  ;;  %v3984_v18 = vld [vmem:[%s5450_s4 + $0x28] sm:$0xff] }
 0xb99   : > { %1868 = vrot.lane.b32.xlu0 %v5090_v48, %s4700_s18 }
 0xb9d   : > { %2189 = vrot.lane.b32.xlu0 %v5116_v2, %s4700_s18  ;;  %v2112_v2 = vpop.permute.xlu1 %2111 }
 0xb9e   : > { %4239 = vmatpush3.msra.mxu1 %v2112_v2 }
 0xb9f   : > { %4254 = vmatprep.subr.mxu1 %v4698_v1 }
 0xc0c   : > { %v2031_v19 = vpop.xlane.xlu0 %2030 }
 0xc0d   : > { %4486 = vrcp.f32 %v2031_v19  ;;  %v5275_v19 = vld [vmem:[%s5450_s4 + $0x20] sm:$0xff] }
 0xc10   : > { %v1869_v5 = vpop.permute.xlu0 %1868 }
 0xc11   : > { %4224 = vmatpush3.msra.mxu0 %v1869_v5 }
 0xc12   : > { %4226 = vmatmul.mubr.msk.f32.vlgmr.msra.gmra.mxu0 %vm534_vm1, %v1863_v7  ;;  %4233 = vmatprep.subr.mxu0 %v4698_v1 }
 0xc13   : > { %4234 = vmatpush3.msra.mxu0 %v2035_v20  ;;  %4235 = vmatprep.mubr.msk.f32.mxu0 %vm4699_vm0, %v4698_v1 }
 0xc14   : > { %4243 = vmatprep.subr.mxu0 %v4698_v1  ;;  %v2190_v8 = vpop.permute.xlu0 %2189 }
 0xc1a   : > { %v4487_v47 = vpop.eup %4486 }
 0xc1b   : > { %v2033_v48 = vmul.f32 %v4487_v47, %v4485_v17  ;;  %v5261_v17 = vld [vmem:[%s5450_s4 + $0x30] sm:$0xff] }
 0xc1d   : > { %4236 = vmatmul.mubr.msk.f32.vlgmr.msra.gmra.mxu0 %vm534_vm1, %v2033_v48 }
 0xc1e   : > { %4251 = vmatprep.mubr.msk.f32.mxu0 %vm4699_vm0, %v4698_v1  ;;  %4244 = vmatpush3.msra.mxu0 %v1138_v37 }
 0xc1f   : > { %4245 = vmatprep.subr.mxu0 %v4698_v1 }
 0xc20   : > { %4246 = vmatpush3.msra.mxu0 %v1137_v3 }
 0xc21   : > { %4247 = vmatprep.subr.mxu0 %v4698_v1 }
 0xc22   : > { %4248 = vmatpush3.msra.mxu0 %v1136_v38 }
 0xc23   : > { %4249 = vmatprep.subr.mxu0 %v4698_v1 }
 0xc24   : > { %4250 = vmatpush3.msra.mxu0 %v1135_v39 }
 0xc25   : > { %4265 = vmatprep.subr.mxu0 %v4698_v1 }
 0xcd2   : > { %v1940_v22 = vpop.f32.mrf.mxu0 }
 0xcd3   : > { %v1944_v23 = vadd.f32 %v1940_v22, %v1699_v21 }
 0xcd4   : > { %v4227_v24 = vpop.f32.mrf.mxu0 }
 0xcdd   : > { %v2106_v25 = vpop.f32.mrf.mxu0 }
 0xcde   : > { %4241 = vmatmul.mubr.msk.f32.vlgmr.msra.gmra.mxu1 %vm534_vm1, %v2106_v25  ;;  %v5285_v25 = vld [vmem:[#allocation7 + $0x8] sm:$0xff] }
 0xcdf   : > { %v4237_v26 = vpop.f32.mrf.mxu0  ;;  %4262 = vmatprep.mubr.msk.f32.mxu1 %vm4699_vm0, %v4698_v1 }
 0xce0   : > { %v5289_v26 = vrot.slane %v5285_v25, %v5013_v43 }
 0xd9e   : > { %v2183_v27 = vpop.f32.mrf.mxu1 }
 0xd9f   : > { %v2187_v12 = vadd.f32 %v2183_v27, %v1944_v23 }
 0xda0   : > { %v4242_v28 = vpop.f32.mrf.mxu1 }
 0xda1   : > { %v2192_v29 = vadd.f32 %v2190_v8, %v2187_v12 }
 0xda3   : > { %v2193_v30 = vadd.f32 %v2192_v29, %v5106_v63  ;;  %v2211_v63 = vrot.slane %v5112_v0, %v5024_v52 }
 0xda5   : > { %v2194_v31 = vsel %vm878_vm14, %v2193_v30, 0.0 }
 0xda6   : > { %2195 = vadd.xlane.f32.xlu1 %v2194_v31 }
 0xdb7   : > { %2306 = vrot.lane.b32.xlu1 %v1138_v37, %s4703_s22 }
 0xdbb   : > { %2304 = vrot.lane.b32.xlu1 %v1137_v3, %s4703_s22 }
 0xdbf   : > { %2300 = vrot.lane.b32.xlu1 %v1135_v39, %s4703_s22 }
 0xe2f   : > { %v2196_v32 = vpop.xlane.xlu1 %2195 }
 0xe30   : > { %v2198_v33 = vmul.f32 0.03125, %v2196_v32 }
 0xe32   : > { %v2199_v34 = vsub.f32 %v2193_v30, %v2198_v33 }
 0xe33   : > { %v2307_v41 = vpop.permute.xlu1 %2306 }
 0xe34   : > { %v2200_v35 = vmul.f32 %v2199_v34, %v2199_v34  ;;  %4255 = vmatpush3.xpose.msk.msra.mxu1 %vm2312_vm15, %v2307_v41 }
 0xe35   : > { %4256 = vmatprep.subr.mxu1 %v4698_v1 }
 0xe36   : > { %v2201_v36 = vsel %vm878_vm14, %v2200_v35, 0.0 }
 0xe37   : > { %2202 = vadd.xlane.f32.xlu0 %v2201_v36  ;;  %v2305_v42 = vpop.permute.xlu1 %2304 }
 0xe38   : > { %4257 = vmatpush3.xpose.msk.msra.mxu1 %vm2312_vm15, %v2305_v42 }
 0xe39   : > { %4258 = vmatprep.subr.mxu1 %v4698_v1 }
 0xe3b   : > { %v2301_v57 = vpop.permute.xlu1 %2300 }
 0xe4d   : > { %2214 = vrot.lane.b32.xlu0 %v2211_v63, %s4702_s21 }
 0xe51   : > { %2302 = vrot.lane.b32.xlu0 %v1136_v38, %s4703_s22 }
 0xe55   : > { %2309 = vrot.lane.b32.xlu0 %v2221_v40, %s4703_s22 }
 0xec0   : > { %v2203_v44 = vpop.xlane.xlu0 %2202 }
 0xec1   : > { %v2204_v46 = vmul.f32 0.03125, %v2203_v44 }
 0xec3   : > { %v2205_v49 = vadd.f32 1e-05, %v2204_v46 }
 0xec4   : > { %v2215_v51 = vpop.permute.xlu0 %2214 }
 0xec5   : > { %4488 = vrsqrt.f32 %v2205_v49 }
 0xec8   : > { %v2303_v0 = vpop.permute.xlu0 %2302 }
 0xec9   : > { %4259 = vmatpush3.xpose.msk.msra.mxu1 %vm2312_vm15, %v2303_v0 }
 0xeca   : > { %4260 = vmatprep.subr.mxu1 %v4698_v1 }
 0xecc   : > { %v2310_v61 = vpop.permute.xlu0 %2309 }
 0xecd   : > { %4261 = vmatpush3.xpose.msk.msra.mxu1 %vm2312_vm15, %v2301_v57 }
 0xece   : > { %4281 = vmatprep.subr.mxu1 %v4698_v1 }
 0xed2   : > { %v4489_v53 = vpop.eup %4488 }
 0xed3   : > { %v2207_v54 = vmul.f32 %v4489_v53, %v2199_v34 }
 0xed5   : > { %v2212_v55 = vmul.f32 %v2211_v63, %v2207_v54 }
 0xed7   : > { %v2217_v56 = vadd.f32 %v2215_v51, %v2212_v55 }
 0xed9   : > { %4252 = vmatmul.mubr.msk.f32.vlgmr.msra.gmra.mxu0 %vm878_vm14, %v2217_v56 }
 0xeda   : > { %4273 = vmatprep.mubr.msk.f32.mxu0 %vm4699_vm0, %v4698_v1  ;;  %4266 = vmatpush3.msra.mxu0 %v5256_v16 }
 0xedb   : > { %4267 = vmatprep.subr.mxu0 %v4698_v1 }
 0xedc   : > { %4268 = vmatpush3.msra.mxu0 %v5261_v17 }
 0xedd   : > { %4269 = vmatprep.subr.mxu0 %v4698_v1 }
 0xede   : > { %4270 = vmatpush3.msra.mxu0 %v3984_v18 }
 0xedf   : > { %4271 = vmatprep.subr.mxu0 %v4698_v1 }
 0xee0   : > { %4272 = vmatpush3.msra.mxu0 %v5275_v19 }
 0xee1   : > { %4276 = vmatprep.subr.mxu0 %v4698_v1 }
 0xf99   : > { %v2291_v58 = vpop.f32.mrf.mxu0 }
 0xf9a   : > { %v2292_v59 = vadd.f32 %v2291_v58, %v2221_v40 }
 0xf9b   : > { %v4253_v50 = vpop.f32.mrf.mxu0 }
 0xf9c   : > { %v2295_v60 = vmax.f32 %v2292_v59, 0.0 }
 0xf9e   : > { %4263 = vmatmul.mubr.msk.f32.vlgmr.msra.gmra.mxu1 %vm2312_vm15, %v2295_v60 }
 0xf9f   : > { %4283 = vmatprep.mubr.msk.f32.mxu1 %vm4699_vm0, %v4698_v1 }
0x105e   : > { %v2390_v62 = vpop.f32.mrf.mxu1 }
0x105f   : > { %v2391_v4 = vadd.f32 %v2390_v62, %v2310_v61 }
0x1060   : > { %v4264_v6 = vpop.f32.mrf.mxu1 }
0x1061   : > { %v2394_v7 = vadd.f32 %v2391_v4, %v2217_v56 }
0x1063   : > { %v2395_v9 = vsel %vm878_vm14, %v2394_v7, 0.0 }
0x1064   : > { %2396 = vadd.xlane.f32.xlu1 %v2395_v9 }
0x1075   : > { %2412 = vrot.lane.b32.xlu1 %v2211_v63, %s4700_s18 }
0x10ed   : > { %v2397_v10 = vpop.xlane.xlu1 %2396 }
0x10ee   : > { %v2398_v11 = vmul.f32 0.03125, %v2397_v10 }
0x10f0   : > { %v2399_v13 = vsub.f32 %v2394_v7, %v2398_v11 }
0x10f1   : > { %v2413_v22 = vpop.permute.xlu1 %2412 }
0x10f2   : > { %v2400_v14 = vmul.f32 %v2399_v13, %v2399_v13 }
0x10f4   : > { %v2401_v15 = vsel %vm878_vm14, %v2400_v14, 0.0 }
0x10f5   : > { %2402 = vadd.xlane.f32.xlu0 %v2401_v15 }
0x110b   : > { %2408 = vrot.lane.b32.xlu0 %v2211_v63, %s4703_s22 }
0x117e   : > { %v2403_v5 = vpop.xlane.xlu0 %2402 }
0x117f   : > { %v2404_v20 = vmul.f32 0.03125, %v2403_v5 }
0x1181   : > { %v2405_v47 = vadd.f32 1e-05, %v2404_v20 }
0x1182   : > { %v2409_v2 = vpop.permute.xlu0 %2408 }
0x1183   : > { %4490 = vrsqrt.f32 %v2405_v47 }
0x1190   : > { %v4491_v48 = vpop.eup %4490 }
0x1191   : > { %v2407_v21 = vmul.f32 %v4491_v48, %v2399_v13 }
0x1193   : > { %v2411_v23 = vmul.f32 %v2409_v2, %v2407_v21 }
0x1195   : > { %v5279_v24 = vadd.f32 %v2413_v22, %v2411_v23 }
0x1197   : > { %4274 = vmatmul.mubr.msk.f32.vlgmr.msra.gmra.mxu0 %vm878_vm14, %v5279_v24 }
0x1198   : > { %4278 = vmatprep.mubr.msk.f32.mxu0 %vm4699_vm0, %v4698_v1 }
0x1257   : > { %v2501_v27 = vpop.f32.mrf.mxu0 }
0x1258   : > { %v5292_v8 = vadd.f32 %v2501_v27, %v5289_v26 }
0x1259   : > { %v4275_v12 = vpop.f32.mrf.mxu0 }
0x125a   : > { %2673 = vrot.lane.b32.xlu0 %v5292_v8, %s4704_s30  ;;  %2507 = vrot.lane.b32.xlu1 %v5292_v8, %s4702_s21  ;;  %v5299_v28 = vmul.f32 0.35355338, %v5292_v8  ;;  %s5469_s30 = smov 40  }
0x125e   : > { %2671 = vrot.lane.b32.xlu1 %v5299_v28, %s4705_s9 }
0x12cc   : > { %v2508_v29 = vpop.permute.xlu1 %2507  ;;  %v2674_v43 = vpop.permute.xlu0 %2673 }
0x12cd   : > { %4277 = vmatpush3.xpose.msk.msra.mxu0 %vm534_vm1, %v2508_v29 }
0x12ce   : > { %4286 = vmatprep.subr.mxu0 %v4698_v1 }
0x12d0   : > { %4279 = vmatmul.mubr.msk.f32.vlgmr.msra.gmra.mxu0 %vm534_vm1, %v5299_v28  ;;  %v2672_v30 = vpop.permute.xlu1 %2671 }
0x12d1   : > { %4287 = vmatpush3.xpose.msk.msra.mxu0 %vm534_vm1, %v2674_v43  ;;  %4288 = vmatprep.mubr.msk.f32.mxu0 %vm4699_vm0, %v4698_v1 }
0x12d2   : > { %4296 = vmatprep.subr.mxu0 %v4698_v1 }
0x12d4   : > { %4289 = vmatmul.mubr.msk.f32.vlgmr.msra.gmra.mxu0 %vm534_vm1, %v2672_v30 }
0x12d5   : > { %4298 = vmatprep.mubr.msk.f32.mxu0 %vm4699_vm0, %v4698_v1 }
0x1390   : > { %v2580_v31 = vpop.f32.mrf.mxu0 }
0x1391   : > { %v2584_v32 = vsel %vm534_vm1, %v2580_v31, -inf }
0x1392   : > { %2585 = vmax.xlane.f32.xlu0 %v2584_v32  ;;  %v4280_v33 = vpop.f32.mrf.mxu0 }
0x1394   : > { %v2745_v34 = vpop.f32.mrf.mxu0 }
0x1395   : > { %v2749_v35 = vsel %vm534_vm1, %v2745_v34, -inf }
0x1396   : > { %2750 = vmax.xlane.f32.xlu1 %v2749_v35  ;;  %v4290_v36 = vpop.f32.mrf.mxu0 }
0x13a7   : > { %2595 = vrot.lane.b32.xlu1 %v5292_v8, %s4703_s22 }
0x13ab   : > { %2837 = vrot.lane.b32.xlu1 %v3984_v18, %s4700_s18 }
0x13af   : > { %2992 = vrot.lane.b32.xlu1 %v5292_v8, %s4706_s10 }
0x141b   : > { %v2586_v37 = vpop.xlane.xlu0 %2585 }
0x141c   : > { %v2587_v3 = vsub.f32 %v2580_v31, %v2586_v37 }
0x141e   : > { %v2588_v38 = vmul.f32 1.442695, %v2587_v3 }
0x141f   : > { %v2751_v63 = vpop.xlane.xlu1 %2750 }
0x1420   : > { %4492 = vpow2.f32 %v2588_v38  ;;  %v2752_v39 = vsub.f32 %v2745_v34, %v2751_v63 }
0x1422   : > { %v2753_v40 = vmul.f32 1.442695, %v2752_v39 }
0x1423   : > { %v2596_v41 = vpop.permute.xlu1 %2595 }
0x1424   : > { %4494 = vpow2.f32 %v2753_v40  ;;  %4282 = vmatpush3.msra.mxu1 %v2596_v41 }
0x1425   : > { %4291 = vmatprep.subr.mxu1 %v4698_v1 }
0x1427   : > { %v2838_v42 = vpop.permute.xlu1 %2837 }
0x1428   : > { %4297 = vmatpush3.msra.mxu0 %v2838_v42 }
0x1429   : > { %4306 = vmatprep.subr.mxu0 %v4698_v1 }
0x142b   : > { %v2993_v61 = vpop.permute.xlu1 %2992 }
0x142d   : > { %v4493_v44 = vpop.eup %4492 }
0x142e   : > { %v2590_v46 = vsel %vm534_vm1, %v4493_v44, 0.0 }
0x142f   : > { %2591 = vadd.xlane.f32.xlu0 %v2590_v46 }
0x1431   : > { %v4495_v49 = vpop.eup %4494 }
0x1432   : > { %v2755_v51 = vsel %vm534_vm1, %v4495_v49, 0.0 }
0x1433   : > { %2756 = vadd.xlane.f32.xlu0 %v2755_v51 }
0x1449   : > { %2760 = vrot.lane.b32.xlu0 %v5292_v8, %s4707_s13 }
0x144d   : > { %2990 = vrot.lane.b32.xlu0 %v5299_v28, %s4708_s14 }
0x14b8   : > { %v2592_v0 = vpop.xlane.xlu0 %2591 }
0x14b9   : > { %4496 = vrcp.f32 %v2592_v0 }
0x14bc   : > { %v2757_v53 = vpop.xlane.xlu0 %2756 }
0x14bd   : > { %4498 = vrcp.f32 %v2757_v53 }
0x14c0   : > { %v2761_v56 = vpop.permute.xlu0 %2760 }
0x14c4   : > { %v2991_v4 = vpop.permute.xlu0 %2990 }
0x14c6   : > { %v4497_v54 = vpop.eup %4496 }
0x14c7   : > { %v2594_v55 = vmul.f32 %v4497_v54, %v4493_v44 }
0x14c9   : > { %4284 = vmatmul.mubr.msk.f32.vlgmr.msra.gmra.mxu1 %vm534_vm1, %v2594_v55 }
0x14ca   : > { %v4499_v57 = vpop.eup %4498  ;;  %4292 = vmatpush3.msra.mxu1 %v2761_v56  ;;  %4293 = vmatprep.mubr.msk.f32.mxu1 %vm4699_vm0, %v4698_v1 }
0x14cb   : > { %v2759_v58 = vmul.f32 %v4499_v57, %v4495_v49  ;;  %4301 = vmatprep.subr.mxu1 %v4698_v1 }
0x14cd   : > { %4294 = vmatmul.mubr.msk.f32.vlgmr.msra.gmra.mxu1 %vm534_vm1, %v2759_v58 }
0x14ce   : > { %4303 = vmatprep.mubr.msk.f32.mxu1 %vm4699_vm0, %v4698_v1 }
0x1589   : > { %v2667_v59 = vpop.f32.mrf.mxu1 }
0x158b   : > { %v4285_v50 = vpop.f32.mrf.mxu1 }
0x158c   : > { %v2424_v50 = vld [vmem:[#allocation6 + $0x30] sm:$0xff] }
0x158d   : > { %v2832_v60 = vpop.f32.mrf.mxu1 }
0x158e   : > { %4299 = vmatmul.mubr.msk.f32.vlgmr.msra.gmra.mxu0 %vm534_vm1, %v2832_v60  ;;  %v2423_v60 = vld [vmem:[#allocation6 + $0x28] sm:$0xff] }
0x158f   : > { %4307 = vmatpush3.xpose.msk.msra.mxu0 %vm534_vm1, %v2993_v61  ;;  %v4295_v62 = vpop.f32.mrf.mxu1  ;;  %4308 = vmatprep.mubr.msk.f32.mxu0 %vm4699_vm0, %v4698_v1  ;;  %v2422_v61 = vld [vmem:[#allocation6 + $0x20] sm:$0xff] }
0x1590   : > { %4316 = vmatprep.subr.mxu0 %v4698_v1  ;;  %v3508_v62 = vrot.slane %v5285_v25, %v5016_v45 }
0x1592   : > { %4309 = vmatmul.mubr.msk.f32.vlgmr.msra.gmra.mxu0 %vm534_vm1, %v2991_v4 }
0x1593   : > { %4318 = vmatprep.mubr.msk.f32.mxu0 %vm4699_vm0, %v4698_v1 }
0x164e   : > { %v5344_v6 = vpop.f32.mrf.mxu0 }
0x1650   : > { %v4300_v7 = vpop.f32.mrf.mxu0 }
0x1652   : > { %v3064_v9 = vpop.f32.mrf.mxu0 }
0x1653   : > { %v3068_v10 = vsel %vm534_vm1, %v3064_v9, -inf }
0x1654   : > { %3069 = vmax.xlane.f32.xlu1 %v3068_v10  ;;  %v4310_v11 = vpop.f32.mrf.mxu0 }
0x1665   : > { %3079 = vrot.lane.b32.xlu1 %v5292_v8, %s4709_s17 }
0x1669   : > { %3235 = vrot.lane.b32.xlu1 %v5292_v8, %s4710_s19 }
0x16dd   : > { %v3070_v13 = vpop.xlane.xlu1 %3069 }
0x16de   : > { %v3071_v14 = vsub.f32 %v3064_v9, %v3070_v13 }
0x16e0   : > { %v3072_v15 = vmul.f32 1.442695, %v3071_v14 }
0x16e1   : > { %v3080_v48 = vpop.permute.xlu1 %3079 }
0x16e2   : > { %4500 = vpow2.f32 %v3072_v15 }
0x16e5   : > { %v3236_v21 = vpop.permute.xlu1 %3235 }
0x16ef   : > { %v4501_v18 = vpop.eup %4500 }
0x16f0   : > { %v3074_v5 = vsel %vm534_vm1, %v4501_v18, 0.0 }
0x16f1   : > { %3075 = vadd.xlane.f32.xlu0 %v3074_v5 }
0x1707   : > { %2914 = vrot.lane.b32.xlu0 %v5275_v19, %s4700_s18 }
0x170b   : > { %3233 = vrot.lane.b32.xlu0 %v5299_v28, %s4711_s25 }
0x177a   : > { %v3076_v20 = vpop.xlane.xlu0 %3075 }
0x177b   : > { %4502 = vrcp.f32 %v3076_v20 }
0x177e   : > { %v2915_v47 = vpop.permute.xlu0 %2914 }
0x177f   : > { %4302 = vmatpush3.msra.mxu1 %v2915_v47 }
0x1780   : > { %4304 = vmatmul.mubr.msk.f32.vlgmr.msra.gmra.mxu1 %vm534_vm1, %v2667_v59  ;;  %4311 = vmatprep.subr.mxu1 %v4698_v1  ;;  %v2425_v59 = vld [vmem:[#allocation6 + $0x38] sm:$0xff] }
0x1781   : > { %4312 = vmatpush3.msra.mxu1 %v3080_v48  ;;  %4313 = vmatprep.mubr.msk.f32.mxu1 %vm4699_vm0, %v4698_v1 }
0x1782   : > { %4321 = vmatprep.subr.mxu1 %v4698_v1  ;;  %v3234_v22 = vpop.permute.xlu0 %3233 }
0x1788   : > { %v4503_v2 = vpop.eup %4502 }
0x1789   : > { %v3078_v19 = vmul.f32 %v4503_v2, %v4501_v18 }
0x178b   : > { %4314 = vmatmul.mubr.msk.f32.vlgmr.msra.gmra.mxu1 %vm534_vm1, %v3078_v19 }
0x178c   : > { %4322 = vmatpush3.xpose.msk.msra.mxu1 %vm534_vm1, %v3236_v21  ;;  %4323 = vmatprep.mubr.msk.f32.mxu1 %vm4699_vm0, %v4698_v1 }
0x178d   : > { %4331 = vmatprep.subr.mxu1 %v4698_v1 }
0x178f   : > { %4324 = vmatmul.mubr.msk.f32.vlgmr.msra.gmra.mxu1 %vm534_vm1, %v3234_v22 }
0x1790   : > { %4333 = vmatprep.mubr.msk.f32.mxu1 %vm4699_vm0, %v4698_v1 }
0x1840   : > { %v2986_v23 = vpop.f32.mrf.mxu1 }
0x1841   : > { %v2987_v3 = vadd.f32 %v2986_v23, %v5344_v6 }
0x1842   : > { %v4305_v27 = vpop.f32.mrf.mxu1 }
0x184b   : > { %v3151_v12 = vpop.f32.mrf.mxu1 }
0x184d   : > { %v4315_v28 = vpop.f32.mrf.mxu1 }
0x184f   : > { %v3307_v29 = vpop.f32.mrf.mxu1 }
0x1850   : > { %v3311_v43 = vsel %vm534_vm1, %v3307_v29, -inf }
0x1851   : > { %3312 = vmax.xlane.f32.xlu1 %v3311_v43  ;;  %v4325_v30 = vpop.f32.mrf.mxu1 }
0x1852   : > { %v3705_v30 = vld [vmem:[#allocation9 + $0x18] sm:$0xff] }
0x1862   : > { %3322 = vrot.lane.b32.xlu1 %v5292_v8, %s5469_s30 }
0x1866   : > { %3399 = vrot.lane.b32.xlu1 %v5256_v16, %s4700_s18 }
0x18da   : > { %v3313_v31 = vpop.xlane.xlu1 %3312 }
0x18db   : > { %v3314_v32 = vsub.f32 %v3307_v29, %v3313_v31  ;;  %v3704_v31 = vld [vmem:[#allocation9 + $0x10] sm:$0xff] }
0x18dd   : > { %v3315_v33 = vmul.f32 1.442695, %v3314_v32  ;;  %v3703_v32 = vld [vmem:[#allocation9 + $0x8] sm:$0xff] }
0x18de   : > { %v3323_v37 = vpop.permute.xlu1 %3322 }
0x18df   : > { %4504 = vpow2.f32 %v3315_v33  ;;  %v3702_v33 = vld [vmem:[#allocation9] sm:$0xff] }
0x18ec   : > { %v4505_v34 = vpop.eup %4504 }
0x18ed   : > { %v3317_v35 = vsel %vm534_vm1, %v4505_v34, 0.0 }
0x18ee   : > { %3318 = vadd.xlane.f32.xlu0 %v3317_v35 }
0x1904   : > { %3156 = vrot.lane.b32.xlu0 %v5261_v17, %s4700_s18 }
0x1908   : > { %3477 = vrot.lane.b32.xlu0 %v5289_v26, %s4700_s18  ;;  %v3400_v26 = vpop.permute.xlu1 %3399 }
0x1909   : > { %4332 = vmatpush3.msra.mxu1 %v3400_v26 }
0x190a   : > { %4347 = vmatprep.subr.mxu1 %v4698_v1 }
0x1977   : > { %v3319_v36 = vpop.xlane.xlu0 %3318 }
0x1978   : > { %4506 = vrcp.f32 %v3319_v36 }
0x197b   : > { %v3157_v8 = vpop.permute.xlu0 %3156 }
0x197c   : > { %4317 = vmatpush3.msra.mxu0 %v3157_v8 }
0x197d   : > { %4319 = vmatmul.mubr.msk.f32.vlgmr.msra.gmra.mxu0 %vm534_vm1, %v3151_v12  ;;  %4326 = vmatprep.subr.mxu0 %v4698_v1 }
0x197e   : > { %4327 = vmatpush3.msra.mxu0 %v3323_v37  ;;  %4328 = vmatprep.mubr.msk.f32.mxu0 %vm4699_vm0, %v4698_v1 }
0x197f   : > { %4336 = vmatprep.subr.mxu0 %v4698_v1  ;;  %v3478_v44 = vpop.permute.xlu0 %3477 }
0x1985   : > { %v4507_v16 = vpop.eup %4506 }
0x1986   : > { %v3321_v17 = vmul.f32 %v4507_v16, %v4505_v34 }
0x1988   : > { %4329 = vmatmul.mubr.msk.f32.vlgmr.msra.gmra.mxu0 %vm534_vm1, %v3321_v17 }
0x1989   : > { %4344 = vmatprep.mubr.msk.f32.mxu0 %vm4699_vm0, %v4698_v1  ;;  %4337 = vmatpush3.msra.mxu0 %v2425_v59 }
0x198a   : > { %4338 = vmatprep.subr.mxu0 %v4698_v1 }
0x198b   : > { %4339 = vmatpush3.msra.mxu0 %v2424_v50 }
0x198c   : > { %4340 = vmatprep.subr.mxu0 %v4698_v1 }
0x198d   : > { %4341 = vmatpush3.msra.mxu0 %v2423_v60 }
0x198e   : > { %4342 = vmatprep.subr.mxu0 %v4698_v1 }
0x198f   : > { %4343 = vmatpush3.msra.mxu0 %v2422_v61 }
0x1990   : > { %4358 = vmatprep.subr.mxu0 %v4698_v1 }
0x1a3d   : > { %v3228_v38 = vpop.f32.mrf.mxu0 }
0x1a3e   : > { %v3232_v63 = vadd.f32 %v3228_v38, %v2987_v3 }
0x1a3f   : > { %v4320_v39 = vpop.f32.mrf.mxu0 }
0x1a48   : > { %v3394_v40 = vpop.f32.mrf.mxu0 }
0x1a49   : > { %4334 = vmatmul.mubr.msk.f32.vlgmr.msra.gmra.mxu1 %vm534_vm1, %v3394_v40  ;;  %vm3805_vm1 = vcmask 0  }
0x1a4a   : > { %v4330_v41 = vpop.f32.mrf.mxu0  ;;  %4355 = vmatprep.mubr.msk.f32.mxu1 %vm4699_vm0, %v4698_v1 }
0x1b09   : > { %v3471_v42 = vpop.f32.mrf.mxu1 }
0x1b0a   : > { %v3475_v46 = vadd.f32 %v3471_v42, %v3232_v63 }
0x1b0b   : > { %v4335_v49 = vpop.f32.mrf.mxu1 }
0x1b0c   : > { %v3480_v51 = vadd.f32 %v3478_v44, %v3475_v46  ;;  %v3706_v46 = vld [vmem:[#allocation9 + $0x20] sm:$0x7] }
0x1b0e   : > { %v3481_v0 = vadd.f32 %v3480_v51, %v5279_v24  ;;  %v3498_v24 = vrot.slane %v5285_v25, %v5024_v52 }
0x1b10   : > { %v3482_v53 = vsel %vm878_vm14, %v3481_v0, 0.0 }
0x1b11   : > { %3483 = vadd.xlane.f32.xlu1 %v3482_v53 }
0x1b22   : > { %3593 = vrot.lane.b32.xlu1 %v2425_v59, %s4703_s22 }
0x1b26   : > { %3591 = vrot.lane.b32.xlu1 %v2424_v50, %s4703_s22 }
0x1b2a   : > { %3587 = vrot.lane.b32.xlu1 %v2422_v61, %s4703_s22 }
0x1b9a   : > { %v3484_v54 = vpop.xlane.xlu1 %3483 }
0x1b9b   : > { %v3485_v55 = vmul.f32 0.03125, %v3484_v54 }
0x1b9d   : > { %v3486_v56 = vsub.f32 %v3481_v0, %v3485_v55 }
0x1b9e   : > { %v3594_v52 = vpop.permute.xlu1 %3593 }
0x1b9f   : > { %v3487_v57 = vmul.f32 %v3486_v56, %v3486_v56  ;;  %4348 = vmatpush3.xpose.msk.msra.mxu1 %vm2312_vm15, %v3594_v52 }
0x1ba0   : > { %4349 = vmatprep.subr.mxu1 %v4698_v1 }
0x1ba1   : > { %v3488_v58 = vsel %vm878_vm14, %v3487_v57, 0.0  ;;  %v3795_v57 = vrot.slane %v3706_v46, 1 }
0x1ba2   : > { %3489 = vadd.xlane.f32.xlu0 %v3488_v58  ;;  %v3592_v4 = vpop.permute.xlu1 %3591 }
0x1ba3   : > { %4350 = vmatpush3.xpose.msk.msra.mxu1 %vm2312_vm15, %v3592_v4 }
0x1ba4   : > { %4351 = vmatprep.subr.mxu1 %v4698_v1 }
0x1ba6   : > { %v3588_v15 = vpop.permute.xlu1 %3587 }
0x1bb8   : > { %3501 = vrot.lane.b32.xlu0 %v3498_v24, %s4702_s21 }
0x1bbc   : > { %3589 = vrot.lane.b32.xlu0 %v2423_v60, %s4703_s22  ;;  %v3802_v60 = vrot.slane %v3706_v46, 2 }
0x1bc0   : > { %3596 = vrot.lane.b32.xlu0 %v3508_v62, %s4703_s22 }
0x1c2b   : > { %v3490_v6 = vpop.xlane.xlu0 %3489 }
0x1c2c   : > { %v3491_v7 = vmul.f32 0.03125, %v3490_v6 }
0x1c2e   : > { %v3492_v9 = vadd.f32 1e-05, %v3491_v7 }
0x1c2f   : > { %v3502_v10 = vpop.permute.xlu0 %3501 }
0x1c30   : > { %4508 = vrsqrt.f32 %v3492_v9 }
0x1c33   : > { %v3590_v45 = vpop.permute.xlu0 %3589 }
0x1c34   : > { %4352 = vmatpush3.xpose.msk.msra.mxu1 %vm2312_vm15, %v3590_v45 }
0x1c35   : > { %4353 = vmatprep.subr.mxu1 %v4698_v1 }
0x1c37   : > { %v3597_v48 = vpop.permute.xlu0 %3596 }
0x1c38   : > { %4354 = vmatpush3.xpose.msk.msra.mxu1 %vm2312_vm15, %v3588_v15 }
0x1c3d   : > { %v4509_v25 = vpop.eup %4508 }
0x1c3e   : > { %v3494_v11 = vmul.f32 %v4509_v25, %v3486_v56 }
0x1c40   : > { %v3499_v13 = vmul.f32 %v3498_v24, %v3494_v11 }
0x1c42   : > { %v3504_v14 = vadd.f32 %v3502_v10, %v3499_v13 }
0x1c44   : > { %4345 = vmatmul.mubr.msk.f32.vlgmr.msra.gmra.mxu0 %vm878_vm14, %v3504_v14 }
0x1c45   : > { %4366 = vmatprep.mubr.msk.f32.mxu0 %vm4699_vm0, %v4698_v1  ;;  %4359 = vmatpush3.msra.mxu0 %v3705_v30  ;;  %vm3798_vm0 = vcmask 516096  }
0x1c46   : > { %4360 = vmatprep.subr.mxu0 %v4698_v1 }
0x1c47   : > { %4361 = vmatpush3.msra.mxu0 %v3704_v31 }
0x1c48   : > { %4362 = vmatprep.subr.mxu0 %v4698_v1 }
0x1c49   : > { %4363 = vmatpush3.msra.mxu0 %v3703_v32 }
0x1c4a   : > { %4364 = vmatprep.subr.mxu0 %v4698_v1 }
0x1c4b   : > { %4365 = vmatpush3.msra.mxu0 %v3702_v33 }
0x1d04   : > { %v3578_v18 = vpop.f32.mrf.mxu0 }
0x1d05   : > { %v3579_v5 = vadd.f32 %v3578_v18, %v3508_v62 }
0x1d06   : > { %v4346_v20 = vpop.f32.mrf.mxu0 }
0x1d07   : > { %v3582_v47 = vmax.f32 %v3579_v5, 0.0 }
0x1d09   : > { %4356 = vmatmul.mubr.msk.f32.vlgmr.msra.gmra.mxu1 %vm2312_vm15, %v3582_v47 }
0x1dc9   : > { %v3676_v2 = vpop.f32.mrf.mxu1 }
0x1dca   : > { %v3677_v19 = vadd.f32 %v3676_v2, %v3597_v48 }
0x1dcb   : > { %v4357_v21 = vpop.f32.mrf.mxu1 }
0x1dcc   : > { %v3680_v22 = vadd.f32 %v3677_v19, %v3504_v14 }
0x1dce   : > { %v3681_v23 = vsel %vm878_vm14, %v3680_v22, 0.0 }
0x1dcf   : > { %3682 = vadd.xlane.f32.xlu1 %v3681_v23 }
0x1de0   : > { %3698 = vrot.lane.b32.xlu1 %v3498_v24, %s4700_s18 }
0x1e58   : > { %v3683_v27 = vpop.xlane.xlu1 %3682 }
0x1e59   : > { %v3684_v12 = vmul.f32 0.03125, %v3683_v27 }
0x1e5b   : > { %v3685_v28 = vsub.f32 %v3680_v22, %v3684_v12 }
0x1e5c   : > { %v3699_v17 = vpop.permute.xlu1 %3698 }
0x1e5d   : > { %v3686_v29 = vmul.f32 %v3685_v28, %v3685_v28 }
0x1e5f   : > { %v3687_v43 = vsel %vm878_vm14, %v3686_v29, 0.0 }
0x1e60   : > { %3688 = vadd.xlane.f32.xlu0 %v3687_v43 }
0x1e76   : > { %3694 = vrot.lane.b32.xlu0 %v3498_v24, %s4703_s22  ;;  %s407_s22 = scalar_lea.vmem %s5454_s8, %s5475_s11 }
0x1ee9   : > { %v3689_v34 = vpop.xlane.xlu0 %3688 }
0x1eea   : > { %v3690_v35 = vmul.f32 0.03125, %v3689_v34 }
0x1eec   : > { %v3691_v36 = vadd.f32 1e-05, %v3690_v35 }
0x1eed   : > { %v3695_v37 = vpop.permute.xlu0 %3694 }
0x1eee   : > { %4510 = vrsqrt.f32 %v3691_v36 }
0x1efb   : > { %v4511_v8 = vpop.eup %4510 }
0x1efc   : > { %v3693_v16 = vmul.f32 %v4511_v8, %v3685_v28 }
0x1efe   : > { %v3697_v26 = vmul.f32 %v3695_v37, %v3693_v16 }
0x1f00   : > { %v3701_v3 = vadd.f32 %v3699_v17, %v3697_v26 }
0x1f02   : > { %v3707_v38 = vsel %vm878_vm14, %v3701_v3, 0.0 }
0x1f03   : > { %v3708_v63 = vrot.slane %v3707_v38, 4 }
0x1f05   : > { %v3709_v39 = vadd.f32 %v3708_v63, %v3707_v38 }
0x1f07   : > { %v3710_v40 = vrot.slane %v3709_v39, 2 }
0x1f09   : > { %v3711_v41 = vadd.f32 %v3710_v40, %v3709_v39 }
0x1f0b   : > { %v3712_v42 = vrot.slane %v3711_v41, 1 }
0x1f0d   : > { %v3713_v44 = vadd.f32 %v3712_v42, %v3711_v41 }
0x1f0f   : > { %v3715_v1 = vmul.f32 0.125, %v3713_v44 }
0x1f11   : > { %4367 = vmatmul.mubr.msk.f32.vlgmr.msra.gmra.mxu0 %vm878_vm14, %v3715_v1 }
0x1fd1   : > { %v3785_v49 = vpop.f32.mrf.mxu0 }
0x1fd2   : > { %v3786_v51 = vadd.f32 %v3785_v49, %v3706_v46 }
0x1fd3   : > { %v4368_v0 = vpop.f32.mrf.mxu0 }
0x1fd4   : > { %v3790_v53 = vmul.f32 0.70710677, %v3786_v51  ;;  %v3789_v55 = vmul.f32 0.5, %v3786_v51 }
0x1fd6   : > { %4512 = verf.f32 %v3790_v53 }
0x1fe3   : > { %v4513_v54 = vpop.eup %4512 }
0x1fe4   : > { %v3792_v56 = vadd.f32 1.0, %v4513_v54 }
0x1fe6   : > { %v3793_v58 = vmul.f32 %v3792_v56, %v3789_v55 }
0x1fe8   : > { %v3797_v59 = vmul.f32 %v3795_v57, %v3793_v58 }
0x1fea   : > { %v3799_v50 = vsel %vm3798_vm0, %v3797_v59, 0.0 }
0x1feb   : > { %3800 = vadd.xlane.f32.xlu1 %v3799_v50 }
0x2074   : > { %v3801_v24 = vpop.xlane.xlu1 %3800 }
0x2075   : > { %v3804_v61 = vadd.f32 %v3802_v60, %v3801_v24 }
0x2077   : > { %3806 = vst.msk [vmem:[%s407_s22] sm:$0x1] %vm3805_vm1, %v3804_v61 }
0x2078 PF: > { %p20_p2 = scmp.ge.s32.totalorder %s4857_s15, 4   ;;  %s5470_s27 = smov %s4680_s28 }
0x2079   : > { %s5471_s28 = smov %s4684_s29  ;;  %s5472_s29 = smov %s4869_s23 }
0x207a   : > { %s5473_s30 = smov %s4857_s15  ;;  %22 = sbr.rel (!%p20_p2) target bundleno = 5 (0x5), region = 117 }
0x207f   :  { %3824 = vsyncpa [#allocation3], 1 }
0x2080   :  { %3826 = vsyncpa [#allocation3 + $0x1], 1 }
0x2081   :  { %3827 = vsyncpa [#allocation5], 1 }
0x2082   :  { %3828 = vsyncpa [#allocation8], 1 }

</bundles_post_ra>
